<compile_context>
chip_gen: v5e
topology: v5e:2x2
jax: 0.10.0
libtpu: 0.0.40
codegen_flags: <defaults>
</compile_context>

<pallas_src>
import functools

import jax
import jax.numpy as jnp
from jax.experimental import pallas as pl
from jax.experimental.pallas import tpu as pltpu


# ----------------------------- Pallas kernel --------------------------------

def _expert_mlp_kernel(x_ref, w1_ref, b1_ref, w2_ref, b2_ref, o_ref):
    # x_ref : (TM, Cp)  bf16      w1_ref: (Cp, Hp) bf16   b1_ref: (1, Hp) f32
    # w2_ref: (Hp, Cp)  bf16      b2_ref: (1, Cp)  f32    o_ref : (TM, Cp) f32
    h = jnp.dot(x_ref[...], w1_ref[...], preferred_element_type=jnp.float32)
    h = jnp.maximum(h + b1_ref[...], 0.0)                       # bias + ReLU in f32
    y = jnp.dot(h.astype(jnp.bfloat16), w2_ref[...],
                preferred_element_type=jnp.float32)
    o_ref[...] = y + b2_ref[...]


# ----------------------------- wrapper ---------------------------------------

def _round_up(x, m):
    return (x + m - 1) // m * m


def _pad2d(a, rows, cols, dtype):
    """Cast to dtype and zero-pad to (rows, cols); no-op copy avoided if aligned."""
    a = a.astype(dtype)
    if a.shape == (rows, cols):
        return a
    return jnp.zeros((rows, cols), dtype).at[:a.shape[0], :a.shape[1]].set(a)


@functools.partial(jax.jit, static_argnames=("tile_m",))
def expert_forward(x, w1, b1, w2, b2, *, tile_m=256):
    """Expert MLP forward (eval mode).

    x : (..., C)       input tokens
    w1: (4C, C), b1: (4C,)   -- PyTorch Linear layout (out_features, in_features)
    w2: (C, 4C), b2: (C,)
    """
    orig_shape = x.shape
    C = orig_shape[-1]
    H = w1.shape[0]                    # 4 * n_embed

    x2 = x.reshape(-1, C)
    M = x2.shape[0]

    # Lane-dense padding: channels -> multiple of 128, rows -> multiple of tile.
    Cp = _round_up(C, 128)
    Hp = _round_up(H, 128)
    tm = min(tile_m, _round_up(M, 8))
    Mp = _round_up(M, tm)

    # Zero-padding is exact: padded input lanes hit zero weight rows, padded
    # hidden lanes are ReLU(0 + 0) = 0 and hit zero rows of W2.
    xp = _pad2d(x2, Mp, Cp, jnp.bfloat16)
    w1p = _pad2d(w1.T, Cp, Hp, jnp.bfloat16)    # (C, H) -> (Cp, Hp)
    w2p = _pad2d(w2.T, Hp, Cp, jnp.bfloat16)    # (H, C) -> (Hp, Cp)
    b1p = _pad2d(b1.reshape(1, H), 1, Hp, jnp.float32)
    b2p = _pad2d(b2.reshape(1, C), 1, Cp, jnp.float32)

    grid = (Mp // tm,)
    flops = 2 * Mp * Cp * Hp * 2                       # two matmuls
    bytes_accessed = ((xp.size + w1p.size + w2p.size) * 2      # bf16 operands
                      + (b1p.size + b2p.size + Mp * Cp) * 4)   # f32 bias + output

    out = pl.pallas_call(
        _expert_mlp_kernel,
        out_shape=jax.ShapeDtypeStruct((Mp, Cp), jnp.float32),
        grid=grid,
        in_specs=[
            pl.BlockSpec((tm, Cp), lambda i: (i, 0)),   # x tile (pipelined over M)
            pl.BlockSpec((Cp, Hp), lambda i: (0, 0)),   # W1 (VMEM-resident)
            pl.BlockSpec((1, Hp), lambda i: (0, 0)),    # b1
            pl.BlockSpec((Hp, Cp), lambda i: (0, 0)),   # W2 (VMEM-resident)
            pl.BlockSpec((1, Cp), lambda i: (0, 0)),    # b2
        ],
        out_specs=pl.BlockSpec((tm, Cp), lambda i: (i, 0)),
        compiler_params=pltpu.CompilerParams(
            dimension_semantics=("parallel",),
            vmem_limit_bytes=64 * 1024 * 1024),
        cost_estimate=pl.CostEstimate(
            flops=int(flops), transcendentals=0,
            bytes_accessed=int(bytes_accessed)),
    )(xp, w1p, b1p, w2p, b2p)

    # Dropout: inference-mode identity (nn.Dropout is a no-op in eval()).
    return out[:M, :C].reshape(orig_shape)


# ----------------------------- demo / smoke test -----------------------------

if __name__ == "__main__":
    # Expert(n_embed=128); tokens: batch=2, seq=256.
    B, T, C = 2, 256, 128
    H = 4 * C

    key = jax.random.PRNGKey(0)
    kx, k1, k2, k3, k4 = jax.random.split(key, 5)

    x = jax.random.normal(kx, (B, T, C), jnp.float32)
    w1 = 0.05 * jax.random.normal(k1, (H, C), jnp.float32)   # torch Linear layout
    b1 = 0.05 * jax.random.normal(k2, (H,), jnp.float32)
    w2 = 0.05 * jax.random.normal(k3, (C, H), jnp.float32)
    b2 = 0.05 * jax.random.normal(k4, (C,), jnp.float32)

    out = expert_forward(x, w1, b1, w2, b2)
    jax.block_until_ready(out)
    assert out.shape == (B, T, C), out.shape
    assert bool(jnp.all(jnp.isfinite(out)))

    # Reference (same bf16 operand quantization as the kernel, f32 accumulate).
    xb = x.astype(jnp.bfloat16).astype(jnp.float32)
    w1b = w1.astype(jnp.bfloat16).astype(jnp.float32)
    w2b = w2.astype(jnp.bfloat16).astype(jnp.float32)
    h_ref = jnp.maximum(xb @ w1b.T + b1, 0.0)
    ref = h_ref.astype(jnp.bfloat16).astype(jnp.float32) @ w2b.T + b2
    assert bool(jnp.allclose(out, ref, rtol=2e-2, atol=2e-2))

    print("KERNEL_OK")
</pallas_src>

<mosaic_0001>
module attributes {stable_mosaic.version = 11 : i64} {
  func.func @_expert_mlp_kernel(%arg0: i32, %arg1: memref<256x128xbf16, #tpu.memory_space<vmem>>, %arg2: memref<128x512xbf16, #tpu.memory_space<vmem>>, %arg3: memref<1x512xf32, #tpu.memory_space<vmem>>, %arg4: memref<512x128xbf16, #tpu.memory_space<vmem>>, %arg5: memref<1x128xf32, #tpu.memory_space<vmem>>, %arg6: memref<256x128xf32, #tpu.memory_space<vmem>>) attributes {dimension_semantics = [#tpu.dimension_semantics<parallel>], iteration_bounds = array<i64: 2>, scalar_prefetch = 0 : i64, scratch_operands = 0 : i64, tpu.core_type = #tpu.core_type<tc>, window_params = [{transform_indices = @transform_0, window_bounds = array<i64: 256, 128>}, {pipeline_mode = #tpu.pipeline_mode<synchronous>, transform_indices = @transform_1, window_bounds = array<i64: 128, 512>}, {pipeline_mode = #tpu.pipeline_mode<synchronous>, transform_indices = @transform_2, window_bounds = array<i64: 1, 512>}, {pipeline_mode = #tpu.pipeline_mode<synchronous>, transform_indices = @transform_3, window_bounds = array<i64: 512, 128>}, {pipeline_mode = #tpu.pipeline_mode<synchronous>, transform_indices = @transform_4, window_bounds = array<i64: 1, 128>}, {transform_indices = @transform_5, window_bounds = array<i64: 256, 128>}]} {
    %c0 = arith.constant 0 : index
    %c0_0 = arith.constant 0 : index
    %0 = vector.load %arg1[%c0, %c0_0] : memref<256x128xbf16, #tpu.memory_space<vmem>>, vector<256x128xbf16>
    %c0_1 = arith.constant 0 : index
    %c0_2 = arith.constant 0 : index
    %1 = vector.load %arg2[%c0_1, %c0_2] : memref<128x512xbf16, #tpu.memory_space<vmem>>, vector<128x512xbf16>
    %cst = arith.constant dense<0.000000e+00> : vector<256x512xf32>
    %2 = tpu.matmul %0, %1, %cst {dimension_numbers = #tpu.dot_dimension_numbers<[1], [0], [0], [1], [0, 0, 1, 1], [], []>} : vector<256x128xbf16>, vector<128x512xbf16>, vector<256x512xf32> -> vector<256x512xf32>
    %c0_3 = arith.constant 0 : index
    %c0_4 = arith.constant 0 : index
    %3 = vector.load %arg3[%c0_3, %c0_4] : memref<1x512xf32, #tpu.memory_space<vmem>>, vector<1x512xf32>
    %4 = vector.broadcast %3 : vector<1x512xf32> to vector<256x512xf32>
    %5 = arith.addf %2, %4 : vector<256x512xf32>
    %cst_5 = arith.constant 0.000000e+00 : f32
    %6 = vector.broadcast %cst_5 : f32 to vector<256x512xf32>
    %7 = arith.maximumf %5, %6 : vector<256x512xf32>
    %8 = arith.truncf %7 : vector<256x512xf32> to vector<256x512xbf16>
    %c0_6 = arith.constant 0 : index
    %c0_7 = arith.constant 0 : index
    %9 = vector.load %arg4[%c0_6, %c0_7] : memref<512x128xbf16, #tpu.memory_space<vmem>>, vector<512x128xbf16>
    %cst_8 = arith.constant dense<0.000000e+00> : vector<256x128xf32>
    %10 = tpu.matmul %8, %9, %cst_8 {dimension_numbers = #tpu.dot_dimension_numbers<[1], [0], [0], [1], [0, 0, 1, 1], [], []>} : vector<256x512xbf16>, vector<512x128xbf16>, vector<256x128xf32> -> vector<256x128xf32>
    %c0_9 = arith.constant 0 : index
    %c0_10 = arith.constant 0 : index
    %11 = vector.load %arg5[%c0_9, %c0_10] : memref<1x128xf32, #tpu.memory_space<vmem>>, vector<1x128xf32>
    %12 = vector.broadcast %11 : vector<1x128xf32> to vector<256x128xf32>
    %13 = arith.addf %10, %12 : vector<256x128xf32>
    %c0_11 = arith.constant 0 : index
    %c0_12 = arith.constant 0 : index
    %14 = vector.load %arg6[%c0_11, %c0_12] : memref<256x128xf32, #tpu.memory_space<vmem>>, vector<256x128xf32>
    tpu.vector_store %arg6[%c0_11, %c0_12], %13 {strides = array<i32>} : memref<256x128xf32, #tpu.memory_space<vmem>>, vector<256x128xf32>,
    return
  }
  func.func @transform_0(%arg0: i32) -> (i32, i32) {
    %c0_i32 = arith.constant 0 : i32
    %c0_i32_0 = arith.constant 0 : i32
    return %arg0, %c0_i32 : i32, i32
  }
  func.func @transform_1(%arg0: i32) -> (i32, i32) {
    %c0_i32 = arith.constant 0 : i32
    %c0_i32_0 = arith.constant 0 : i32
    %c0_i32_1 = arith.constant 0 : i32
    return %c0_i32, %c0_i32_0 : i32, i32
  }
  func.func @transform_2(%arg0: i32) -> (i32, i32) {
    %c0_i32 = arith.constant 0 : i32
    %c0_i32_0 = arith.constant 0 : i32
    %c0_i32_1 = arith.constant 0 : i32
    return %c0_i32, %c0_i32_0 : i32, i32
  }
  func.func @transform_3(%arg0: i32) -> (i32, i32) {
    %c0_i32 = arith.constant 0 : i32
    %c0_i32_0 = arith.constant 0 : i32
    %c0_i32_1 = arith.constant 0 : i32
    return %c0_i32, %c0_i32_0 : i32, i32
  }
  func.func @transform_4(%arg0: i32) -> (i32, i32) {
    %c0_i32 = arith.constant 0 : i32
    %c0_i32_0 = arith.constant 0 : i32
    %c0_i32_1 = arith.constant 0 : i32
    return %c0_i32, %c0_i32_0 : i32, i32
  }
  func.func @transform_5(%arg0: i32) -> (i32, i32) {
    %c0_i32 = arith.constant 0 : i32
    %c0_i32_0 = arith.constant 0 : i32
    return %arg0, %c0_i32 : i32, i32
  }
}

</mosaic_0001>

<bundles_post_ra>
// kernel: expert_forward.1
= control target key start
LH: loop header
LB: loop body
LE: loop exit
PB: predicated region body
PF: predicated region fallthrough
CT: control target
= control target key end

     0   :  { %10 = vsyncpa [#allocation3], 0  ;;  %s3178_s0 = inlined_call_operand.vmem [shape: bf16[512,128], index: 0, kind: input, shape index: {}]   ;;  %s3179_s1 = inlined_call_operand.vmem [shape: bf16[128,512], index: 1, kind: input, shape index: {}]   ;;  %s3180_s2 = inlined_call_operand.vmem [shape: f32[1,512], index: 2, kind: input, shape index: {}]   ;;  %s3181_s3 = inlined_call_operand.vmem [shape: bf16[512,128], index: 3, kind: input, shape index: {}]   ;;  %s3182_s4 = inlined_call_operand.vmem [shape: f32[1,128], index: 4, kind: input, shape index: {}]   ;;  %s3183_s5 = inlined_call_operand.hbm [shape: f32[512,128], index: 5, kind: output, shape index: {}]  }
   0x1   :  { %12 = vsyncpa [#allocation3 + $0x1], 0  ;;  %s2381_s18 = smov 0   ;;  %s2383_s19 = smov 0  }
   0x2   :  { %s2385_s20 = smov 0   ;;  %s2387_s21 = smov 0  }
   0x3 LB: > { %s2402_s22 = sadd.s32 4294967295, %s2347_s21   ;;  %s1830_s23 = sadd.s32 4294967294, %s2347_s21   ;;  %s2347_s21 = sphi %s2387_s21, %s3189_s21   ;;  %s2343_s20 = sphi %s2385_s20, %s3188_s20   ;;  %s2339_s19 = sphi %s2383_s19, %s3187_s19   ;;  %s2335_s18 = sphi %s2381_s18, %s3186_s18  }
   0x4   : > { %s2406_s24 = sadd.s32 1, %s2347_s21   ;;  %s135_s25 = sadd.s32 1, %s2343_s20 }
   0x5   : > { %s132_s26 = ssub.s32 %s2347_s21, %s2406_s24  ;;  %p145_p0 = scmp.ne.s32.totalorder %s2343_s20, %s2339_s19 }
   0x6   : > { %p133_p1 = scmp.eq.s32.totalorder %s132_s26, 0  ;;  %p146_p2 = scmp.eq.s32.totalorder %s2402_s22, 1 }
   0x7   : > { %p151_p3 = scmp.ne.s32.totalorder %s2339_s19, %s2335_s18  ;;  %p152_p4 = scmp.eq.s32.totalorder %s1830_s23, 1 }
   0x8   : > { %s2417_s27 = scalar_select %p133_p1, %s2343_s20, %s135_s25  }
   0x9   : > { %p2419_p5 = por %p146_p2, %p145_p0  ;;  %p2423_p6 = por %p152_p4, %p151_p3 }
   0xa   : > { %p1833_p7 = scmp.ge.s32.totalorder %s2347_s21, 1  ;;  %p191_p8 = scmp.lt.s32.totalorder %s2347_s21, 3 }
   0xc   : > { %p192_p9 = pnand %p1833_p7, %p191_p8 }
   0xd   : > { %s1835_s25 = sshll.u32 (!%p192_p9), %s2402_s22, 5  ;;  %s216_s17 = sand.u32 (!%p192_p9), 1, %s2339_s19  }
   0xe   : > { %195 = sbr.rel (%p192_p9) target bundleno = 698 (0x2ba), region = 40  ;;  %p220_p10 = scmp.lt.s32.totalorder (!%p192_p9), %s1835_s25, 63 }
   0xf   : > { %s1834_s23 = sshll.u32 (!%p192_p9), %s216_s17, 8  ;;  %s2242_s30 = sshll.u32 (!%p192_p9), %s2402_s22, 8 }
  0x10   : > { %s3052_s26 = scalar_lea.vmem (!%p192_p9), [#allocation2], %s1834_s23  ;;  %s1764_s8 = scalar_lea.hbm (!%p192_p9), %s3183_s5, %s2242_s30 }
  0x11   : > { %s1765_s9 = sshll.u32 (!%p192_p9), %s3052_s26, 4  ;;  %s1767_s11 = sshll.u32 (!%p192_p9), %s1764_s8, 4  ;;  %s1766_s9 = int_to_ptr.vmem [resolvable:$true] %s1765_s9  ;;  %s1768_s11 = int_to_ptr.hbm [resolvable:$true] %s1767_s11 }
  0x12   : > { %s1753_s22 = scalar_lea.sflag (!%p192_p9), [#allocation3], %s216_s17  ;;  %s2299_s12 = sshra.s32 (!%p192_p9), %s1768_s11, 4  ;;  %s2300_s12 = int_to_ptr.hbm [resolvable:$true] %s2299_s12 }
  0x13   : > { %v2015_v0 = vld [vmem:[%s3179_s1 + $0xe0] sm:$0xf]  ;;  %v2208_v1 = vld [vmem:[%s3179_s1 + $0xec] sm:$0xf0]  ;;  %v2206_v2 = vld [vmem:[%s3179_s1 + $0xe4] sm:$0xf]  ;;  %p2306_p0 = scmp.lt.s32.totalorder %s2300_s12, %s3183_s5 }
  0x14   : > { %v2016_v3 = vor.u32 %v2208_v1, %v2015_v0  ;;  %v2017_v4 = vld [vmem:[%s3179_s1 + $0xf0] sm:$0xf0]  ;;  %v2023_v5 = vld [vmem:[%s3179_s1 + $0xe8] sm:$0xf]  ;;  %v2209_v6 = vld [vmem:[%s3179_s1 + $0xf4] sm:$0xf0] }
  0x15   : > { %v2020_v7 = vor.u32 %v2206_v2, %v2017_v4  ;;  %v2024_v8 = vor.u32 %v2209_v6, %v2023_v5  ;;  %v2207_v9 = vld [vmem:[%s3179_s1 + $0xec] sm:$0xf]  ;;  %v2025_v10 = vld [vmem:[%s3179_s1 + $0xf8] sm:$0xf0]  ;;  %v1999_v11 = vld [vmem:[%s3179_s1 + $0xc0] sm:$0xf] }
  0x16   : > { %556 = vmatpush.bf16.msra.mxu0 %v2016_v3  ;;  %v2028_v12 = vor.u32 %v2207_v9, %v2025_v10  ;;  %v2204_v13 = vld [vmem:[%s3179_s1 + $0xcc] sm:$0xf0]  ;;  %v2202_v14 = vld [vmem:[%s3179_s1 + $0xc4] sm:$0xf]  ;;  %v2001_v15 = vld [vmem:[%s3179_s1 + $0xd0] sm:$0xf0] }
  0x17   : > { %645 = vmatpush.bf16.msra.mxu1 %v2020_v7  ;;  %734 = vmatpush.bf16.msra.mxu2 %v2024_v8  ;;  %v2000_v16 = vor.u32 %v2204_v13, %v1999_v11  ;;  %v2004_v17 = vor.u32 %v2202_v14, %v2001_v15  ;;  %v2007_v18 = vld [vmem:[%s3179_s1 + $0xc8] sm:$0xf]  ;;  %v2205_v19 = vld [vmem:[%s3179_s1 + $0xd4] sm:$0xf0]  ;;  %v2203_v20 = vld [vmem:[%s3179_s1 + $0xcc] sm:$0xf] }
  0x18   : > { %823 = vmatpush.bf16.msra.mxu3 %v2028_v12  ;;  %v2008_v21 = vor.u32 %v2205_v19, %v2007_v18  ;;  %v2009_v22 = vld [vmem:[%s3179_s1 + $0xd8] sm:$0xf0]  ;;  %v1983_v23 = vld [vmem:[%s3179_s1 + $0xa0] sm:$0xf]  ;;  %v2200_v24 = vld [vmem:[%s3179_s1 + $0xac] sm:$0xf0] }
  0x19   : > { %v2012_v25 = vor.u32 %v2203_v20, %v2009_v22  ;;  %v2198_v26 = vld [vmem:[%s3179_s1 + $0xa4] sm:$0xf]  ;;  %v1985_v27 = vld [vmem:[%s3179_s1 + $0xb0] sm:$0xf0]  ;;  %v1991_v28 = vld [vmem:[%s3179_s1 + $0xa8] sm:$0xf]  ;;  %v1984_v29 = vor.u32 %v2200_v24, %v1983_v23 }
  0x1a   : > { %557 = vmatpush.bf16.msra.mxu0 %v2000_v16  ;;  %v2201_v30 = vld [vmem:[%s3179_s1 + $0xb4] sm:$0xf0]  ;;  %v2199_v31 = vld [vmem:[%s3179_s1 + $0xac] sm:$0xf]  ;;  %v1993_v32 = vld [vmem:[%s3179_s1 + $0xb8] sm:$0xf0]  ;;  %v1988_v33 = vor.u32 %v2198_v26, %v1985_v27 }
  0x1b   : > { %646 = vmatpush.bf16.msra.mxu1 %v2004_v17  ;;  %735 = vmatpush.bf16.msra.mxu2 %v2008_v21  ;;  %v1992_v34 = vor.u32 %v2201_v30, %v1991_v28  ;;  %v1967_v35 = vld [vmem:[%s3179_s1 + $0x80] sm:$0xf]  ;;  %v2196_v36 = vld [vmem:[%s3179_s1 + $0x8c] sm:$0xf0]  ;;  %v2194_v37 = vld [vmem:[%s3179_s1 + $0x84] sm:$0xf]  ;;  %v1996_v38 = vor.u32 %v2199_v31, %v1993_v32 }
  0x1c   : > { %824 = vmatpush.bf16.msra.mxu3 %v2012_v25  ;;  %v1969_v39 = vld [vmem:[%s3179_s1 + $0x90] sm:$0xf0]  ;;  %v1975_v40 = vld [vmem:[%s3179_s1 + $0x88] sm:$0xf]  ;;  %v2197_v41 = vld [vmem:[%s3179_s1 + $0x94] sm:$0xf0]  ;;  %v1968_v44 = vor.u32 %v2196_v36, %v1967_v35 }
  0x1d   : > { %v2195_v42 = vld [vmem:[%s3179_s1 + $0x8c] sm:$0xf]  ;;  %v1977_v43 = vld [vmem:[%s3179_s1 + $0x98] sm:$0xf0]  ;;  %v1972_v45 = vor.u32 %v2194_v37, %v1969_v39  ;;  %v1976_v46 = vor.u32 %v2197_v41, %v1975_v40  ;;  %v1951_v47 = vld [vmem:[%s3179_s1 + $0x60] sm:$0xf] }
  0x1e   : > { %558 = vmatpush.bf16.msra.mxu0 %v1984_v29  ;;  %v2192_v48 = vld [vmem:[%s3179_s1 + $0x6c] sm:$0xf0]  ;;  %v2190_v49 = vld [vmem:[%s3179_s1 + $0x64] sm:$0xf]  ;;  %v1980_v50 = vor.u32 %v2195_v42, %v1977_v43  ;;  %v1953_v51 = vld [vmem:[%s3179_s1 + $0x70] sm:$0xf0] }
  0x1f   : > { %647 = vmatpush.bf16.msra.mxu1 %v1988_v33  ;;  %736 = vmatpush.bf16.msra.mxu2 %v1992_v34  ;;  %v1959_v52 = vld [vmem:[%s3179_s1 + $0x68] sm:$0xf]  ;;  %v2193_v53 = vld [vmem:[%s3179_s1 + $0x74] sm:$0xf0]  ;;  %v2191_v54 = vld [vmem:[%s3179_s1 + $0x6c] sm:$0xf]  ;;  %v1952_v56 = vor.u32 %v2192_v48, %v1951_v47  ;;  %v1956_v57 = vor.u32 %v2190_v49, %v1953_v51 }
  0x20   : > { %825 = vmatpush.bf16.msra.mxu3 %v1996_v38  ;;  %v1961_v55 = vld [vmem:[%s3179_s1 + $0x78] sm:$0xf0]  ;;  %v1960_v58 = vor.u32 %v2193_v53, %v1959_v52  ;;  %v1935_v59 = vld [vmem:[%s3179_s1 + $0x40] sm:$0xf]  ;;  %v2188_v60 = vld [vmem:[%s3179_s1 + $0x4c] sm:$0xf0] }
  0x21   : > { %v2186_v61 = vld [vmem:[%s3179_s1 + $0x44] sm:$0xf]  ;;  %v1964_v62 = vor.u32 %v2191_v54, %v1961_v55  ;;  %v1937_v63 = vld [vmem:[%s3179_s1 + $0x50] sm:$0xf0]  ;;  %v1943_v0 = vld [vmem:[%s3179_s1 + $0x48] sm:$0xf]  ;;  %v1936_v4 = vor.u32 %v2188_v60, %v1935_v59 }
  0x22   : > { %559 = vmatpush.bf16.msra.mxu0 %v1968_v44  ;;  %v2189_v1 = vld [vmem:[%s3179_s1 + $0x54] sm:$0xf0]  ;;  %v2187_v2 = vld [vmem:[%s3179_s1 + $0x4c] sm:$0xf]  ;;  %v1945_v3 = vld [vmem:[%s3179_s1 + $0x58] sm:$0xf0]  ;;  %v1940_v7 = vor.u32 %v2186_v61, %v1937_v63 }
  0x23   : > { %648 = vmatpush.bf16.msra.mxu1 %v1972_v45  ;;  %737 = vmatpush.bf16.msra.mxu2 %v1976_v46  ;;  %v1919_v5 = vld [vmem:[%s3179_s1 + $0x20] sm:$0xf]  ;;  %v2184_v6 = vld [vmem:[%s3179_s1 + $0x2c] sm:$0xf0]  ;;  %v1944_v8 = vor.u32 %v2189_v1, %v1943_v0  ;;  %v2182_v9 = vld [vmem:[%s3179_s1 + $0x24] sm:$0xf]  ;;  %v1948_v12 = vor.u32 %v2187_v2, %v1945_v3 }
  0x24   : > { %826 = vmatpush.bf16.msra.mxu3 %v1980_v50  ;;  %v1921_v10 = vld [vmem:[%s3179_s1 + $0x30] sm:$0xf0]  ;;  %v1927_v11 = vld [vmem:[%s3179_s1 + $0x28] sm:$0xf]  ;;  %v2185_v13 = vld [vmem:[%s3179_s1 + $0x34] sm:$0xf0]  ;;  %v1920_v16 = vor.u32 %v2184_v6, %v1919_v5 }
  0x25   : > { %v2183_v14 = vld [vmem:[%s3179_s1 + $0x2c] sm:$0xf]  ;;  %v1929_v15 = vld [vmem:[%s3179_s1 + $0x38] sm:$0xf0]  ;;  %v1903_v17 = vld [vmem:[%s3179_s1] sm:$0xf]  ;;  %v1924_v18 = vor.u32 %v2182_v9, %v1921_v10  ;;  %v1928_v19 = vor.u32 %v2185_v13, %v1927_v11 }
  0x26   : > { %560 = vmatpush.bf16.msra.mxu0 %v1952_v56  ;;  %v2180_v20 = vld [vmem:[%s3179_s1 + $0xc] sm:$0xf0]  ;;  %v2178_v21 = vld [vmem:[%s3179_s1 + $0x4] sm:$0xf]  ;;  %s3191_s25 = smov (!%p220_p10, %s1835_s25), 63  ;;  %v1932_v22 = vor.u32 %v2183_v14, %v1929_v15  ;;  %v2233_v32 = vld [vmem:[%s3181_s3 + $0xb8] sm:$0xff] }
  0x27   : > { %649 = vmatpush.bf16.msra.mxu1 %v1956_v57  ;;  %738 = vmatpush.bf16.msra.mxu2 %v1960_v58  ;;  %v1905_v23 = vld [vmem:[%s3179_s1 + $0x10] sm:$0xf0]  ;;  %v1911_v24 = vld [vmem:[%s3179_s1 + $0x8] sm:$0xf]  ;;  %v2181_v25 = vld [vmem:[%s3179_s1 + $0x14] sm:$0xf0]  ;;  %v1904_v28 = vor.u32 %v2180_v20, %v1903_v17 }
  0x28   : > { %827 = vmatpush.bf16.msra.mxu3 %v1964_v62  ;;  %v2179_v26 = vld [vmem:[%s3179_s1 + $0xc] sm:$0xf]  ;;  %v1913_v27 = vld [vmem:[%s3179_s1 + $0x18] sm:$0xf0]  ;;  %s1836_s7 = sshll.u32 %s3191_s25, 2  ;;  %v1908_v29 = vor.u32 %v2178_v21, %v1905_v23  ;;  %v1912_v30 = vor.u32 %v2181_v25, %v1911_v24  ;;  %v2232_v37 = vld [vmem:[%s3181_s3 + $0xb0] sm:$0xff] }
  0x29   : > { %s2625_s10 = scalar_lea.vmem %s3178_s0, %s1836_s7  ;;  %v1916_v31 = vor.u32 %v2179_v26, %v1913_v27  ;;  %v2241_v34 = vld [vmem:[%s3181_s3 + $0xf8] sm:$0xff]  ;;  %v2216_v38 = vld [vmem:[%s3181_s3 + $0x30] sm:$0xff]  ;;  %v2231_v43 = vld [vmem:[%s3181_s3 + $0xa8] sm:$0xff]  ;;  %s2301_s25 = scalar_lea.hbm %s2300_s12, 256 }
  0x2a   : > { %561 = vmatpush.bf16.msra.mxu0 %v1936_v4  ;;  %v2162_v33 = vld [vmem:[%s2625_s10] sm:$0xff]  ;;  %v2217_v35 = vld [vmem:[%s3181_s3 + $0x38] sm:$0xff]  ;;  %v2240_v39 = vld [vmem:[%s3181_s3 + $0xf0] sm:$0xff]  ;;  %p2302_p11 = scmp.ne.s32.totalorder %s2300_s12, %s2301_s25  ;;  %s2305_s15 = scalar_lea.hbm %s3183_s5, 512 }
  0x2b   : > { %650 = vmatpush.bf16.msra.mxu1 %v1940_v7  ;;  %739 = vmatpush.bf16.msra.mxu2 %v1944_v8  ;;  %v2225_v36 = vld [vmem:[%s3181_s3 + $0x78] sm:$0xff]  ;;  %v2224_v40 = vld [vmem:[%s3181_s3 + $0x70] sm:$0xff]  ;;  %v2163_v41 = vld [vmem:[%s2625_s10 + $0x8] sm:$0xff]  ;;  %p2307_p1 = scmp.lt.s32.totalorder %s2305_s15, %s2301_s25 }
  0x2c   : > { %828 = vmatpush.bf16.msra.mxu3 %v1948_v12  ;;  %v2164_v42 = vld [vmem:[%s2625_s10 + $0x10] sm:$0xff]  ;;  %v2215_v44 = vld [vmem:[%s3181_s3 + $0x28] sm:$0xff]  ;;  %v2165_v47 = vld [vmem:[%s2625_s10 + $0x18] sm:$0xff]  ;;  %p2303_p12 = pnand %p2302_p11, %p2419_p5 }
  0x2d   : > { %v2239_v45 = vld [vmem:[%s3181_s3 + $0xe8] sm:$0xff]  ;;  %v2166_v48 = vld [vmem:[%s2625_s10 + $0x20] sm:$0xff]  ;;  %v2168_v54 = vld [vmem:[%s2625_s10 + $0x30] sm:$0xff]  ;;  %p2308_p2 = por %p2307_p1, %p2306_p0 }
  0x2e   : > { %562 = vmatpush.bf16.msra.mxu0 %v1920_v16  ;;  %v2223_v46 = vld [vmem:[%s3181_s3 + $0x68] sm:$0xff]  ;;  %v2230_v49 = vld [vmem:[%s3181_s3 + $0xa0] sm:$0xff]  ;;  %v2229_v55 = vld [vmem:[%s3181_s3 + $0x98] sm:$0xff]  ;;  %p2304_p13 = pneg %p2303_p12 }
  0x2f   : > { %651 = vmatpush.bf16.msra.mxu1 %v1924_v18  ;;  %740 = vmatpush.bf16.msra.mxu2 %v1928_v19  ;;  %v2214_v50 = vld [vmem:[%s3181_s3 + $0x20] sm:$0xff]  ;;  %v2167_v53 = vld [vmem:[%s2625_s10 + $0x28] sm:$0xff]  ;;  %v2213_v56 = vld [vmem:[%s3181_s3 + $0x18] sm:$0xff] }
  0x30   : > { %829 = vmatpush.bf16.msra.mxu3 %v1932_v22  ;;  %v2238_v51 = vld [vmem:[%s3181_s3 + $0xe0] sm:$0xff]  ;;  %v2237_v57 = vld [vmem:[%s3181_s3 + $0xd8] sm:$0xff]  ;;  %v2228_v2 = vld [vmem:[%s3181_s3 + $0x90] sm:$0xff]  ;;  %p2309_p3 = pnand %p2308_p2, %p2304_p13 }
  0x31   : > { %v2222_v52 = vld [vmem:[%s3181_s3 + $0x60] sm:$0xff]  ;;  %v2221_v58 = vld [vmem:[%s3181_s3 + $0x58] sm:$0xff]  ;;  %v2212_v3 = vld [vmem:[%s3181_s3 + $0x10] sm:$0xff] }
  0x32   : > { %563 = vmatpush.bf16.msra.mxu0 %v1904_v28  ;;  %v2169_v59 = vld [vmem:[%s2625_s10 + $0x38] sm:$0xff]  ;;  %v2170_v60 = vld [vmem:[%s2625_s10 + $0x40] sm:$0xff]  ;;  %v2236_v4 = vld [vmem:[%s3181_s3 + $0xd0] sm:$0xff] }
  0x33   : > { %652 = vmatpush.bf16.msra.mxu1 %v1908_v29  ;;  %741 = vmatpush.bf16.msra.mxu2 %v1912_v30  ;;  %v290_v61 = vld [vmem:[%s3180_s2] sm:$0xf]  ;;  %v2220_v17 = vld [vmem:[%s3181_s3 + $0x50] sm:$0xff]  ;;  %v2171_v25 = vld [vmem:[%s2625_s10 + $0x48] sm:$0xff] }
  0x34   : > { %830 = vmatpush.bf16.msra.mxu3 %v1916_v31  ;;  %v2699_v0 = vperm.slane %v290_v61, 0  ;;  %v2701_v1 = vperm.slane %v290_v61, 1  ;;  %v2715_v12 = vperm.slane %v290_v61, 2  ;;  %v2718_v15 = vperm.slane %v290_v61, 3 }
  0x35   : > { %564 = vmatmul.bf16.vlgmr.msra.gmra.mxu0 %v2162_v33 }
  0x36   : > { %653 = vmatmul.bf16.vlgmr.msra.gmra.mxu1 %v2162_v33  ;;  %742 = vmatmul.bf16.vlgmr.msra.gmra.mxu2 %v2162_v33 }
  0x37   : > { %1542 = vmatpush.bf16.msrb.mxu2 %v2233_v32  ;;  %831 = vmatmul.bf16.vlgmr.msra.gmra.mxu3 %v2162_v33 }
  0x38   : > { %1631 = vmatpush.bf16.msrb.mxu3 %v2241_v34  ;;  %1364 = vmatpush.bf16.msrb.mxu0 %v2217_v35 }
  0x39   : > { %1453 = vmatpush.bf16.msrb.mxu1 %v2225_v36 }
  0x3b   : > { %1543 = vmatpush.bf16.msrb.mxu2 %v2232_v37 }
  0x3c   : > { %1632 = vmatpush.bf16.msrb.mxu3 %v2240_v39  ;;  %1365 = vmatpush.bf16.msrb.mxu0 %v2216_v38 }
  0x3d   : > { %1454 = vmatpush.bf16.msrb.mxu1 %v2224_v40 }
  0x3f   : > { %1544 = vmatpush.bf16.msrb.mxu2 %v2231_v43 }
  0x40   : > { %1366 = vmatpush.bf16.msrb.mxu0 %v2215_v44  ;;  %1633 = vmatpush.bf16.msrb.mxu3 %v2239_v45 }
  0x41   : > { %1455 = vmatpush.bf16.msrb.mxu1 %v2223_v46 }
  0x43   : > { %1545 = vmatpush.bf16.msrb.mxu2 %v2230_v49 }
  0x44   : > { %1367 = vmatpush.bf16.msrb.mxu0 %v2214_v50  ;;  %1634 = vmatpush.bf16.msrb.mxu3 %v2238_v51 }
  0x45   : > { %569 = vmatmul.bf16.gmra.mxu0 %v2163_v41  ;;  %1456 = vmatpush.bf16.msrb.mxu1 %v2222_v52 }
  0x46   : > { %658 = vmatmul.bf16.gmra.mxu1 %v2163_v41  ;;  %747 = vmatmul.bf16.gmra.mxu2 %v2163_v41 }
  0x47   : > { %836 = vmatmul.bf16.gmra.mxu3 %v2163_v41  ;;  %1546 = vmatpush.bf16.msrb.mxu2 %v2229_v55 }
  0x48   : > { %1368 = vmatpush.bf16.msrb.mxu0 %v2213_v56  ;;  %1635 = vmatpush.bf16.msrb.mxu3 %v2237_v57 }
  0x49   : > { %1457 = vmatpush.bf16.msrb.mxu1 %v2221_v58 }
  0x4b   : > { %1547 = vmatpush.bf16.msrb.mxu2 %v2228_v2 }
  0x4c   : > { %1369 = vmatpush.bf16.msrb.mxu0 %v2212_v3  ;;  %1636 = vmatpush.bf16.msrb.mxu3 %v2236_v4  ;;  %v2227_v3 = vld [vmem:[%s3181_s3 + $0x88] sm:$0xff] }
  0x4d   : > { %1458 = vmatpush.bf16.msrb.mxu1 %v2220_v17  ;;  %v2211_v4 = vld [vmem:[%s3181_s3 + $0x8] sm:$0xff] }
  0x4f   : > { %1548 = vmatpush.bf16.msrb.mxu2 %v2227_v3 }
  0x50   : > { %1370 = vmatpush.bf16.msrb.mxu0 %v2211_v4 }
  0x55   : > { %574 = vmatmul.bf16.gmra.mxu0 %v2164_v42 }
  0x56   : > { %663 = vmatmul.bf16.gmra.mxu1 %v2164_v42  ;;  %752 = vmatmul.bf16.gmra.mxu2 %v2164_v42 }
  0x57   : > { %841 = vmatmul.bf16.gmra.mxu3 %v2164_v42 }
  0x65   : > { %579 = vmatmul.bf16.gmra.mxu0 %v2165_v47 }
  0x66   : > { %668 = vmatmul.bf16.gmra.mxu1 %v2165_v47  ;;  %757 = vmatmul.bf16.gmra.mxu2 %v2165_v47 }
  0x67   : > { %846 = vmatmul.bf16.gmra.mxu3 %v2165_v47 }
  0x75   : > { %584 = vmatmul.bf16.gmra.mxu0 %v2166_v48 }
  0x76   : > { %673 = vmatmul.bf16.gmra.mxu1 %v2166_v48  ;;  %762 = vmatmul.bf16.gmra.mxu2 %v2166_v48 }
  0x77   : > { %851 = vmatmul.bf16.gmra.mxu3 %v2166_v48 }
  0x85   : > { %589 = vmatmul.bf16.gmra.mxu0 %v2167_v53 }
  0x86   : > { %678 = vmatmul.bf16.gmra.mxu1 %v2167_v53  ;;  %767 = vmatmul.bf16.gmra.mxu2 %v2167_v53 }
  0x87   : > { %856 = vmatmul.bf16.gmra.mxu3 %v2167_v53 }
  0x95   : > { %594 = vmatmul.bf16.gmra.mxu0 %v2168_v54 }
  0x96   : > { %683 = vmatmul.bf16.gmra.mxu1 %v2168_v54  ;;  %772 = vmatmul.bf16.gmra.mxu2 %v2168_v54 }
  0x97   : > { %861 = vmatmul.bf16.gmra.mxu3 %v2168_v54  ;;  %v2172_v54 = vld [vmem:[%s2625_s10 + $0x50] sm:$0xff] }
  0xa5   : > { %599 = vmatmul.bf16.gmra.mxu0 %v2169_v59 }
  0xa6   : > { %688 = vmatmul.bf16.gmra.mxu1 %v2169_v59  ;;  %777 = vmatmul.bf16.gmra.mxu2 %v2169_v59 }
  0xa7   : > { %866 = vmatmul.bf16.gmra.mxu3 %v2169_v59 }
  0xb2   : > { %v565_v62 = vpop.f32.mrf.mxu0 }
  0xb3   : > { %v654_v63 = vpop.f32.mrf.mxu1  ;;  %v566_v5 = vadd.f32 %v565_v62, %v2699_v0 }
  0xb4   : > { %v655_v7 = vadd.f32 %v654_v63, %v2701_v1 }
  0xb5   : > { %604 = vmatmul.bf16.gmra.mxu0 %v2170_v60  ;;  %v912_v14 = vmax.f32 %v566_v5, 0.0  ;;  %v2235_v5 = vld [vmem:[%s3181_s3 + $0xc8] sm:$0xff] }
  0xb6   : > { %693 = vmatmul.bf16.gmra.mxu1 %v2170_v60  ;;  %782 = vmatmul.bf16.gmra.mxu2 %v2170_v60  ;;  %v913_v18 = vmax.f32 %v655_v7, 0.0 }
  0xb7   : > { %871 = vmatmul.bf16.gmra.mxu3 %v2170_v60 }
  0xb8   : > { %1637 = vmatpush.bf16.msrb.mxu3 %v2235_v5 }
  0xb9   : > { %v743_v6 = vpop.f32.mrf.mxu2 }
  0xba   : > { %v832_v8 = vpop.f32.mrf.mxu3  ;;  %v567_v9 = vpop.f32.mrf.mxu0  ;;  %v744_v21 = vadd.f32 %v743_v6, %v2715_v12 }
  0xbb   : > { %v568_v10 = vadd.f32 %v567_v9, %v2699_v0  ;;  %v656_v11 = vpop.f32.mrf.mxu1  ;;  %v833_v23 = vadd.f32 %v832_v8, %v2718_v15 }
  0xbc   : > { %v657_v13 = vadd.f32 %v656_v11, %v2701_v1  ;;  %v914_v31 = vmax.f32 %v744_v21, 0.0 }
  0xbd   : > { %v916_v16 = vmax.f32 %v568_v10, 0.0  ;;  %v915_v33 = vmax.f32 %v833_v23, 0.0 }
  0xbe   : > { %v917_v19 = vmax.f32 %v657_v13, 0.0 }
  0xbf   : > { %v2723_v20 = vpack.c.bf16 %v916_v16, %v912_v14 }
  0xc0   : > { %v2726_v22 = vpack.c.bf16 %v917_v19, %v913_v18  ;;  %v2219_v19 = vld [vmem:[%s3181_s3 + $0x48] sm:$0xff] }
  0xc1   : > { %v745_v24 = vpop.f32.mrf.mxu2  ;;  %1459 = vmatpush.bf16.msrb.mxu1 %v2219_v19 }
  0xc2   : > { %v746_v26 = vadd.f32 %v745_v24, %v2715_v12  ;;  %v834_v27 = vpop.f32.mrf.mxu3  ;;  %v570_v28 = vpop.f32.mrf.mxu0 }
  0xc3   : > { %v835_v29 = vadd.f32 %v834_v27, %v2718_v15  ;;  %v659_v30 = vpop.f32.mrf.mxu1  ;;  %v571_v37 = vadd.f32 %v570_v28, %v2699_v0 }
  0xc4   : > { %v918_v32 = vmax.f32 %v746_v26, 0.0  ;;  %v660_v39 = vadd.f32 %v659_v30, %v2701_v1 }
  0xc5   : > { %v919_v34 = vmax.f32 %v835_v29, 0.0  ;;  %609 = vmatmul.bf16.gmra.mxu0 %v2171_v25  ;;  %v920_v45 = vmax.f32 %v571_v37, 0.0  ;;  %v2173_v29 = vld [vmem:[%s2625_s10 + $0x58] sm:$0xff] }
  0xc6   : > { %v2732_v35 = vpack.c.bf16 %v918_v32, %v914_v31  ;;  %698 = vmatmul.bf16.gmra.mxu1 %v2171_v25  ;;  %787 = vmatmul.bf16.gmra.mxu2 %v2171_v25  ;;  %v921_v47 = vmax.f32 %v660_v39, 0.0 }
  0xc7   : > { %v2734_v36 = vpack.c.bf16 %v919_v34, %v915_v33  ;;  %876 = vmatmul.bf16.gmra.mxu3 %v2171_v25 }
  0xc9   : > { %v748_v38 = vpop.f32.mrf.mxu2 }
  0xca   : > { %v837_v40 = vpop.f32.mrf.mxu3  ;;  %v572_v41 = vpop.f32.mrf.mxu0  ;;  %v749_v50 = vadd.f32 %v748_v38, %v2715_v12 }
  0xcb   : > { %v573_v42 = vadd.f32 %v572_v41, %v2699_v0  ;;  %v661_v43 = vpop.f32.mrf.mxu1  ;;  %v838_v52 = vadd.f32 %v837_v40, %v2718_v15 }
  0xcc   : > { %v662_v44 = vadd.f32 %v661_v43, %v2701_v1  ;;  %v922_v60 = vmax.f32 %v749_v50, 0.0 }
  0xcd   : > { %v924_v46 = vmax.f32 %v573_v42, 0.0  ;;  %v923_v62 = vmax.f32 %v838_v52, 0.0 }
  0xce   : > { %v925_v48 = vmax.f32 %v662_v44, 0.0 }
  0xcf   : > { %v2740_v49 = vpack.c.bf16 %v924_v46, %v920_v45 }
  0xd0   : > { %v2743_v51 = vpack.c.bf16 %v925_v48, %v921_v47 }
  0xd1   : > { %v750_v53 = vpop.f32.mrf.mxu2 }
  0xd2   : > { %v751_v55 = vadd.f32 %v750_v53, %v2715_v12  ;;  %v839_v56 = vpop.f32.mrf.mxu3  ;;  %v575_v57 = vpop.f32.mrf.mxu0 }
  0xd3   : > { %v840_v58 = vadd.f32 %v839_v56, %v2718_v15  ;;  %v664_v59 = vpop.f32.mrf.mxu1  ;;  %v576_v7 = vadd.f32 %v575_v57, %v2699_v0 }
  0xd4   : > { %v926_v61 = vmax.f32 %v751_v55, 0.0  ;;  %v665_v9 = vadd.f32 %v664_v59, %v2701_v1 }
  0xd5   : > { %v927_v63 = vmax.f32 %v840_v58, 0.0  ;;  %614 = vmatmul.bf16.gmra.mxu0 %v2172_v54  ;;  %v928_v17 = vmax.f32 %v576_v7, 0.0 }
  0xd6   : > { %703 = vmatmul.bf16.gmra.mxu1 %v2172_v54  ;;  %792 = vmatmul.bf16.gmra.mxu2 %v2172_v54  ;;  %v2749_v2 = vpack.c.bf16 %v926_v61, %v922_v60  ;;  %v929_v21 = vmax.f32 %v665_v9, 0.0 }
  0xd7   : > { %881 = vmatmul.bf16.gmra.mxu3 %v2172_v54  ;;  %v2760_v6 = vpack.c.bf16 %v927_v63, %v923_v62  ;;  %v2174_v62 = vld [vmem:[%s2625_s10 + $0x60] sm:$0xff] }
  0xd9   : > { %v753_v8 = vpop.f32.mrf.mxu2 }
  0xda   : > { %v842_v10 = vpop.f32.mrf.mxu3  ;;  %v577_v11 = vpop.f32.mrf.mxu0  ;;  %v754_v25 = vadd.f32 %v753_v8, %v2715_v12 }
  0xdb   : > { %v578_v13 = vadd.f32 %v577_v11, %v2699_v0  ;;  %v666_v14 = vpop.f32.mrf.mxu1  ;;  %v843_v27 = vadd.f32 %v842_v10, %v2718_v15 }
  0xdc   : > { %v667_v16 = vadd.f32 %v666_v14, %v2701_v1  ;;  %v930_v37 = vmax.f32 %v754_v25, 0.0  ;;  %v2226_v14 = vld [vmem:[%s3181_s3 + $0x80] sm:$0xff] }
  0xdd   : > { %v932_v18 = vmax.f32 %v578_v13, 0.0  ;;  %v931_v39 = vmax.f32 %v843_v27, 0.0  ;;  %1549 = vmatpush.bf16.msrb.mxu2 %v2226_v14 }
  0xde   : > { %v933_v23 = vmax.f32 %v667_v16, 0.0  ;;  %v2210_v16 = vld [vmem:[%s3181_s3] sm:$0xff] }
  0xdf   : > { %v2769_v24 = vpack.c.bf16 %v932_v18, %v928_v17  ;;  %v2234_v17 = vld [vmem:[%s3181_s3 + $0xc0] sm:$0xff]  ;;  %1371 = vmatpush.bf16.msrb.mxu0 %v2210_v16 }
  0xe0   : > { %v2772_v26 = vpack.c.bf16 %v933_v23, %v929_v21  ;;  %1638 = vmatpush.bf16.msrb.mxu3 %v2234_v17 }
  0xe1   : > { %v755_v28 = vpop.f32.mrf.mxu2 }
  0xe2   : > { %v756_v30 = vadd.f32 %v755_v28, %v2715_v12  ;;  %v844_v31 = vpop.f32.mrf.mxu3  ;;  %v580_v32 = vpop.f32.mrf.mxu0 }
  0xe3   : > { %v845_v33 = vadd.f32 %v844_v31, %v2718_v15  ;;  %v669_v34 = vpop.f32.mrf.mxu1  ;;  %v581_v43 = vadd.f32 %v580_v32, %v2699_v0 }
  0xe4   : > { %v934_v38 = vmax.f32 %v756_v30, 0.0  ;;  %v670_v45 = vadd.f32 %v669_v34, %v2701_v1 }
  0xe5   : > { %v935_v40 = vmax.f32 %v845_v33, 0.0  ;;  %619 = vmatmul.bf16.gmra.mxu0 %v2173_v29  ;;  %v936_v53 = vmax.f32 %v581_v43, 0.0  ;;  %v2218_v33 = vld [vmem:[%s3181_s3 + $0x40] sm:$0xff] }
  0xe6   : > { %708 = vmatmul.bf16.gmra.mxu1 %v2173_v29  ;;  %797 = vmatmul.bf16.gmra.mxu2 %v2173_v29  ;;  %v2778_v41 = vpack.c.bf16 %v934_v38, %v930_v37  ;;  %v937_v55 = vmax.f32 %v670_v45, 0.0  ;;  %v2175_v45 = vld [vmem:[%s2625_s10 + $0x68] sm:$0xff] }
  0xe7   : > { %886 = vmatmul.bf16.gmra.mxu3 %v2173_v29  ;;  %v2780_v42 = vpack.c.bf16 %v935_v40, %v931_v39  ;;  %1460 = vmatpush.bf16.msrb.mxu1 %v2218_v33 }
  0xe9   : > { %v758_v44 = vpop.f32.mrf.mxu2 }
  0xea   : > { %v847_v46 = vpop.f32.mrf.mxu3  ;;  %v582_v47 = vpop.f32.mrf.mxu0  ;;  %v759_v58 = vadd.f32 %v758_v44, %v2715_v12 }
  0xeb   : > { %v583_v48 = vadd.f32 %v582_v47, %v2699_v0  ;;  %v671_v50 = vpop.f32.mrf.mxu1  ;;  %v848_v60 = vadd.f32 %v847_v46, %v2718_v15 }
  0xec   : > { %v672_v52 = vadd.f32 %v671_v50, %v2701_v1  ;;  %v938_v8 = vmax.f32 %v759_v58, 0.0 }
  0xed   : > { %v940_v54 = vmax.f32 %v583_v48, 0.0  ;;  %v939_v10 = vmax.f32 %v848_v60, 0.0 }
  0xee   : > { %v941_v56 = vmax.f32 %v672_v52, 0.0 }
  0xef   : > { %v2786_v57 = vpack.c.bf16 %v940_v54, %v936_v53 }
  0xf0   : > { %v2789_v59 = vpack.c.bf16 %v941_v56, %v937_v55 }
  0xf1   : > { %v760_v61 = vpop.f32.mrf.mxu2 }
  0xf2   : > { %v761_v63 = vadd.f32 %v760_v61, %v2715_v12  ;;  %v849_v3 = vpop.f32.mrf.mxu3  ;;  %v585_v4 = vpop.f32.mrf.mxu0 }
  0xf3   : > { %v850_v5 = vadd.f32 %v849_v3, %v2718_v15  ;;  %v674_v7 = vpop.f32.mrf.mxu1  ;;  %v586_v19 = vadd.f32 %v585_v4, %v2699_v0 }
  0xf4   : > { %v942_v9 = vmax.f32 %v761_v63, 0.0  ;;  %v675_v23 = vadd.f32 %v674_v7, %v2701_v1 }
  0xf5   : > { %v943_v11 = vmax.f32 %v850_v5, 0.0  ;;  %624 = vmatmul.bf16.gmra.mxu0 %v2174_v62  ;;  %v944_v31 = vmax.f32 %v586_v19, 0.0 }
  0xf6   : > { %713 = vmatmul.bf16.gmra.mxu1 %v2174_v62  ;;  %802 = vmatmul.bf16.gmra.mxu2 %v2174_v62  ;;  %v2795_v13 = vpack.c.bf16 %v942_v9, %v938_v8  ;;  %v945_v34 = vmax.f32 %v675_v23, 0.0 }
  0xf7   : > { %891 = vmatmul.bf16.gmra.mxu3 %v2174_v62  ;;  %v2806_v18 = vpack.c.bf16 %v943_v11, %v939_v10 }
  0xf9   : > { %v763_v21 = vpop.f32.mrf.mxu2 }
  0xfa   : > { %v852_v25 = vpop.f32.mrf.mxu3  ;;  %v587_v27 = vpop.f32.mrf.mxu0  ;;  %v764_v39 = vadd.f32 %v763_v21, %v2715_v12 }
  0xfb   : > { %v588_v28 = vadd.f32 %v587_v27, %v2699_v0  ;;  %v676_v29 = vpop.f32.mrf.mxu1  ;;  %v853_v43 = vadd.f32 %v852_v25, %v2718_v15  ;;  %v2176_v25 = vld [vmem:[%s2625_s10 + $0x70] sm:$0xff] }
  0xfc   : > { %v677_v30 = vadd.f32 %v676_v29, %v2701_v1  ;;  %v946_v53 = vmax.f32 %v764_v39, 0.0 }
  0xfd   : > { %v948_v32 = vmax.f32 %v588_v28, 0.0  ;;  %v947_v55 = vmax.f32 %v853_v43, 0.0 }
  0xfe   : > { %v949_v37 = vmax.f32 %v677_v30, 0.0 }
  0xff   : > { %v2815_v38 = vpack.c.bf16 %v948_v32, %v944_v31 }
 0x100   : > { %v2818_v40 = vpack.c.bf16 %v949_v37, %v945_v34 }
 0x101   : > { %v765_v44 = vpop.f32.mrf.mxu2 }
 0x102   : > { %v766_v46 = vadd.f32 %v765_v44, %v2715_v12  ;;  %v854_v47 = vpop.f32.mrf.mxu3  ;;  %v590_v48 = vpop.f32.mrf.mxu0 }
 0x103   : > { %v855_v50 = vadd.f32 %v854_v47, %v2718_v15  ;;  %v679_v52 = vpop.f32.mrf.mxu1  ;;  %v591_v61 = vadd.f32 %v590_v48, %v2699_v0 }
 0x104   : > { %v950_v54 = vmax.f32 %v766_v46, 0.0  ;;  %v680_v63 = vadd.f32 %v679_v52, %v2701_v1 }
 0x105   : > { %v951_v56 = vmax.f32 %v855_v50, 0.0  ;;  %629 = vmatmul.bf16.gmra.mxu0 %v2175_v45  ;;  %v952_v9 = vmax.f32 %v591_v61, 0.0 }
 0x106   : > { %718 = vmatmul.bf16.gmra.mxu1 %v2175_v45  ;;  %807 = vmatmul.bf16.gmra.mxu2 %v2175_v45  ;;  %v2824_v58 = vpack.c.bf16 %v950_v54, %v946_v53  ;;  %v953_v11 = vmax.f32 %v680_v63, 0.0 }
 0x107   : > { %896 = vmatmul.bf16.gmra.mxu3 %v2175_v45  ;;  %v2826_v60 = vpack.c.bf16 %v951_v56, %v947_v55 }
 0x109   : > { %v768_v62 = vpop.f32.mrf.mxu2 }
 0x10a   : > { %v857_v3 = vpop.f32.mrf.mxu3  ;;  %v592_v4 = vpop.f32.mrf.mxu0  ;;  %v769_v17 = vadd.f32 %v768_v62, %v2715_v12 }
 0x10b   : > { %v593_v5 = vadd.f32 %v592_v4, %v2699_v0  ;;  %v681_v7 = vpop.f32.mrf.mxu1  ;;  %v858_v21 = vadd.f32 %v857_v3, %v2718_v15 }
 0x10c   : > { %v682_v8 = vadd.f32 %v681_v7, %v2701_v1  ;;  %v954_v32 = vmax.f32 %v769_v17, 0.0  ;;  %v2177_v7 = vld [vmem:[%s2625_s10 + $0x78] sm:$0xff] }
 0x10d   : > { %v956_v10 = vmax.f32 %v593_v5, 0.0  ;;  %v955_v34 = vmax.f32 %v858_v21, 0.0 }
 0x10e   : > { %v957_v14 = vmax.f32 %v682_v8, 0.0 }
 0x10f   : > { %v2832_v16 = vpack.c.bf16 %v956_v10, %v952_v9 }
 0x110   : > { %v2835_v19 = vpack.c.bf16 %v957_v14, %v953_v11 }
 0x111   : > { %v770_v23 = vpop.f32.mrf.mxu2 }
 0x112   : > { %v771_v27 = vadd.f32 %v770_v23, %v2715_v12  ;;  %v859_v28 = vpop.f32.mrf.mxu3  ;;  %v595_v29 = vpop.f32.mrf.mxu0 }
 0x113   : > { %v860_v30 = vadd.f32 %v859_v28, %v2718_v15  ;;  %v684_v31 = vpop.f32.mrf.mxu1  ;;  %v596_v44 = vadd.f32 %v595_v29, %v2699_v0 }
 0x114   : > { %v958_v33 = vmax.f32 %v771_v27, 0.0  ;;  %v685_v46 = vadd.f32 %v684_v31, %v2701_v1 }
 0x115   : > { %v959_v37 = vmax.f32 %v860_v30, 0.0  ;;  %634 = vmatmul.bf16.gmra.mxu0 %v2176_v25  ;;  %v960_v54 = vmax.f32 %v596_v44, 0.0 }
 0x116   : > { %723 = vmatmul.bf16.gmra.mxu1 %v2176_v25  ;;  %812 = vmatmul.bf16.gmra.mxu2 %v2176_v25  ;;  %v2841_v39 = vpack.c.bf16 %v958_v33, %v954_v32  ;;  %v961_v56 = vmax.f32 %v685_v46, 0.0 }
 0x117   : > { %901 = vmatmul.bf16.gmra.mxu3 %v2176_v25  ;;  %v2843_v43 = vpack.c.bf16 %v959_v37, %v955_v34 }
 0x119   : > { %v773_v45 = vpop.f32.mrf.mxu2 }
 0x11a   : > { %v862_v47 = vpop.f32.mrf.mxu3  ;;  %v597_v48 = vpop.f32.mrf.mxu0  ;;  %v774_v63 = vadd.f32 %v773_v45, %v2715_v12 }
 0x11b   : > { %v598_v50 = vadd.f32 %v597_v48, %v2699_v0  ;;  %v686_v52 = vpop.f32.mrf.mxu1  ;;  %v863_v4 = vadd.f32 %v862_v47, %v2718_v15 }
 0x11c   : > { %v687_v53 = vadd.f32 %v686_v52, %v2701_v1  ;;  %v962_v17 = vmax.f32 %v774_v63, 0.0 }
 0x11d   : > { %v964_v55 = vmax.f32 %v598_v50, 0.0  ;;  %v963_v23 = vmax.f32 %v863_v4, 0.0 }
 0x11e   : > { %v965_v61 = vmax.f32 %v687_v53, 0.0 }
 0x11f   : > { %v2849_v62 = vpack.c.bf16 %v964_v55, %v960_v54 }
 0x120   : > { %v2852_v3 = vpack.c.bf16 %v965_v61, %v961_v56 }
 0x121   : > { %v775_v5 = vpop.f32.mrf.mxu2 }
 0x122   : > { %v776_v8 = vadd.f32 %v775_v5, %v2715_v12  ;;  %v864_v9 = vpop.f32.mrf.mxu3  ;;  %v600_v10 = vpop.f32.mrf.mxu0 }
 0x123   : > { %v865_v11 = vadd.f32 %v864_v9, %v2718_v15  ;;  %v689_v14 = vpop.f32.mrf.mxu1  ;;  %v601_v29 = vadd.f32 %v600_v10, %v2699_v0 }
 0x124   : > { %v966_v21 = vmax.f32 %v776_v8, 0.0  ;;  %v690_v31 = vadd.f32 %v689_v14, %v2701_v1 }
 0x125   : > { %v967_v25 = vmax.f32 %v865_v11, 0.0  ;;  %639 = vmatmul.bf16.gmra.mxu0 %v2177_v7  ;;  %v968_v45 = vmax.f32 %v601_v29, 0.0 }
 0x126   : > { %728 = vmatmul.bf16.gmra.mxu1 %v2177_v7  ;;  %817 = vmatmul.bf16.gmra.mxu2 %v2177_v7  ;;  %v2858_v27 = vpack.c.bf16 %v966_v21, %v962_v17  ;;  %v969_v47 = vmax.f32 %v690_v31, 0.0 }
 0x127   : > { %906 = vmatmul.bf16.gmra.mxu3 %v2177_v7  ;;  %v2860_v28 = vpack.c.bf16 %v967_v25, %v963_v23 }
 0x129   : > { %v778_v30 = vpop.f32.mrf.mxu2 }
 0x12a   : > { %v867_v32 = vpop.f32.mrf.mxu3  ;;  %v602_v33 = vpop.f32.mrf.mxu0  ;;  %v779_v52 = vadd.f32 %v778_v30, %v2715_v12 }
 0x12b   : > { %v603_v34 = vadd.f32 %v602_v33, %v2699_v0  ;;  %v691_v37 = vpop.f32.mrf.mxu1  ;;  %v868_v54 = vadd.f32 %v867_v32, %v2718_v15 }
 0x12c   : > { %v692_v44 = vadd.f32 %v691_v37, %v2701_v1  ;;  %v970_v7 = vmax.f32 %v779_v52, 0.0 }
 0x12d   : > { %v972_v46 = vmax.f32 %v603_v34, 0.0  ;;  %v971_v9 = vmax.f32 %v868_v54, 0.0 }
 0x12e   : > { %v973_v48 = vmax.f32 %v692_v44, 0.0 }
 0x12f   : > { %v2866_v50 = vpack.c.bf16 %v972_v46, %v968_v45 }
 0x130   : > { %v2869_v53 = vpack.c.bf16 %v973_v48, %v969_v47 }
 0x131   : > { %v780_v55 = vpop.f32.mrf.mxu2 }
 0x132   : > { %v781_v56 = vadd.f32 %v780_v55, %v2715_v12  ;;  %v869_v61 = vpop.f32.mrf.mxu3  ;;  %v605_v63 = vpop.f32.mrf.mxu0 }
 0x133   : > { %v870_v4 = vadd.f32 %v869_v61, %v2718_v15  ;;  %v694_v5 = vpop.f32.mrf.mxu1  ;;  %v606_v17 = vadd.f32 %v605_v63, %v2699_v0 }
 0x134   : > { %v974_v8 = vmax.f32 %v781_v56, 0.0  ;;  %v695_v23 = vadd.f32 %v694_v5, %v2701_v1 }
 0x135   : > { %v975_v10 = vmax.f32 %v870_v4, 0.0  ;;  %1372 = vmatmul.bf16.vlgmr.msrb.gmra.mxu0 %v2723_v20  ;;  %v976_v31 = vmax.f32 %v606_v17, 0.0 }
 0x136   : > { %1461 = vmatmul.bf16.vlgmr.msrb.gmra.mxu1 %v2726_v22  ;;  %1550 = vmatmul.bf16.vlgmr.msrb.gmra.mxu2 %v2732_v35  ;;  %v2877_v11 = vpack.c.bf16 %v974_v8, %v970_v7  ;;  %v977_v32 = vmax.f32 %v695_v23, 0.0 }
 0x137   : > { %1639 = vmatmul.bf16.vlgmr.msrb.gmra.mxu3 %v2734_v36  ;;  %v2880_v14 = vpack.c.bf16 %v975_v10, %v971_v9 }
 0x139   : > { %v783_v21 = vpop.f32.mrf.mxu2 }
 0x13a   : > { %v872_v25 = vpop.f32.mrf.mxu3  ;;  %v607_v29 = vpop.f32.mrf.mxu0  ;;  %v784_v36 = vadd.f32 %v783_v21, %v2715_v12 }
 0x13b   : > { %v608_v30 = vadd.f32 %v607_v29, %v2699_v0  ;;  %v696_v20 = vpop.f32.mrf.mxu1  ;;  %v873_v44 = vadd.f32 %v872_v25, %v2718_v15 }
 0x13c   : > { %v697_v22 = vadd.f32 %v696_v20, %v2701_v1  ;;  %v978_v55 = vmax.f32 %v784_v36, 0.0 }
 0x13d   : > { %v980_v35 = vmax.f32 %v608_v30, 0.0  ;;  %v979_v61 = vmax.f32 %v873_v44, 0.0 }
 0x13e   : > { %v981_v33 = vmax.f32 %v697_v22, 0.0 }
 0x13f   : > { %v2886_v34 = vpack.c.bf16 %v980_v35, %v976_v31 }
 0x140   : > { %v2889_v37 = vpack.c.bf16 %v981_v33, %v977_v32 }
 0x141   : > { %v785_v45 = vpop.f32.mrf.mxu2 }
 0x142   : > { %v786_v46 = vadd.f32 %v785_v45, %v2715_v12  ;;  %v874_v47 = vpop.f32.mrf.mxu3  ;;  %v610_v48 = vpop.f32.mrf.mxu0 }
 0x143   : > { %v875_v52 = vadd.f32 %v874_v47, %v2718_v15  ;;  %v699_v54 = vpop.f32.mrf.mxu1  ;;  %v611_v7 = vadd.f32 %v610_v48, %v2699_v0 }
 0x144   : > { %v982_v56 = vmax.f32 %v786_v46, 0.0  ;;  %v700_v9 = vadd.f32 %v699_v54, %v2701_v1 }
 0x145   : > { %v983_v63 = vmax.f32 %v875_v52, 0.0  ;;  %1377 = vmatmul.bf16.gmra.mxu0 %v2740_v49  ;;  %v984_v23 = vmax.f32 %v611_v7, 0.0 }
 0x146   : > { %1466 = vmatmul.bf16.gmra.mxu1 %v2743_v51  ;;  %1555 = vmatmul.bf16.gmra.mxu2 %v2749_v2  ;;  %v2897_v4 = vpack.c.bf16 %v982_v56, %v978_v55  ;;  %v985_v25 = vmax.f32 %v700_v9, 0.0 }
 0x147   : > { %1644 = vmatmul.bf16.gmra.mxu3 %v2760_v6  ;;  %v2900_v5 = vpack.c.bf16 %v983_v63, %v979_v61 }
 0x149   : > { %v788_v8 = vpop.f32.mrf.mxu2 }
 0x14a   : > { %v877_v10 = vpop.f32.mrf.mxu3  ;;  %v612_v17 = vpop.f32.mrf.mxu0  ;;  %v789_v6 = vadd.f32 %v788_v8, %v2715_v12 }
 0x14b   : > { %v613_v21 = vadd.f32 %v612_v17, %v2699_v0  ;;  %v701_v49 = vpop.f32.mrf.mxu1  ;;  %v878_v22 = vadd.f32 %v877_v10, %v2718_v15 }
 0x14c   : > { %v702_v51 = vadd.f32 %v701_v49, %v2701_v1  ;;  %v986_v45 = vmax.f32 %v789_v6, 0.0 }
 0x14d   : > { %v988_v2 = vmax.f32 %v613_v21, 0.0  ;;  %v987_v47 = vmax.f32 %v878_v22, 0.0 }
 0x14e   : > { %v989_v29 = vmax.f32 %v702_v51, 0.0 }
 0x14f   : > { %v2906_v30 = vpack.c.bf16 %v988_v2, %v984_v23 }
 0x150   : > { %v2909_v20 = vpack.c.bf16 %v989_v29, %v985_v25 }
 0x151   : > { %v790_v31 = vpop.f32.mrf.mxu2 }
 0x152   : > { %v791_v35 = vadd.f32 %v790_v31, %v2715_v12  ;;  %v879_v32 = vpop.f32.mrf.mxu3  ;;  %v615_v33 = vpop.f32.mrf.mxu0 }
 0x153   : > { %v880_v36 = vadd.f32 %v879_v32, %v2718_v15  ;;  %v704_v44 = vpop.f32.mrf.mxu1  ;;  %v616_v55 = vadd.f32 %v615_v33, %v2699_v0 }
 0x154   : > { %v990_v46 = vmax.f32 %v791_v35, 0.0  ;;  %v705_v61 = vadd.f32 %v704_v44, %v2701_v1 }
 0x155   : > { %v991_v48 = vmax.f32 %v880_v36, 0.0  ;;  %1382 = vmatmul.bf16.gmra.mxu0 %v2769_v24  ;;  %v992_v9 = vmax.f32 %v616_v55, 0.0 }
 0x156   : > { %1471 = vmatmul.bf16.gmra.mxu1 %v2772_v26  ;;  %1560 = vmatmul.bf16.gmra.mxu2 %v2778_v41  ;;  %v2917_v52 = vpack.c.bf16 %v990_v46, %v986_v45  ;;  %v993_v10 = vmax.f32 %v705_v61, 0.0 }
 0x157   : > { %1649 = vmatmul.bf16.gmra.mxu3 %v2780_v42  ;;  %v2920_v54 = vpack.c.bf16 %v991_v48, %v987_v47 }
 0x159   : > { %v793_v56 = vpop.f32.mrf.mxu2 }
 0x15a   : > { %v882_v63 = vpop.f32.mrf.mxu3  ;;  %v617_v7 = vpop.f32.mrf.mxu0  ;;  %v794_v42 = vadd.f32 %v793_v56, %v2715_v12 }
 0x15b   : > { %v618_v8 = vadd.f32 %v617_v7, %v2699_v0  ;;  %v706_v24 = vpop.f32.mrf.mxu1  ;;  %v883_v51 = vadd.f32 %v882_v63, %v2718_v15 }
 0x15c   : > { %v707_v26 = vadd.f32 %v706_v24, %v2701_v1  ;;  %v994_v31 = vmax.f32 %v794_v42, 0.0 }
 0x15d   : > { %v996_v41 = vmax.f32 %v618_v8, 0.0  ;;  %v995_v32 = vmax.f32 %v883_v51, 0.0 }
 0x15e   : > { %v997_v17 = vmax.f32 %v707_v26, 0.0 }
 0x15f   : > { %v2926_v21 = vpack.c.bf16 %v996_v41, %v992_v9 }
 0x160   : > { %v2929_v49 = vpack.c.bf16 %v997_v17, %v993_v10 }
 0x161   : > { %v795_v23 = vpop.f32.mrf.mxu2 }
 0x162   : > { %v796_v2 = vadd.f32 %v795_v23, %v2715_v12  ;;  %v884_v25 = vpop.f32.mrf.mxu3  ;;  %v620_v29 = vpop.f32.mrf.mxu0 }
 0x163   : > { %v885_v6 = vadd.f32 %v884_v25, %v2718_v15  ;;  %v709_v22 = vpop.f32.mrf.mxu1  ;;  %v621_v45 = vadd.f32 %v620_v29, %v2699_v0 }
 0x164   : > { %v998_v35 = vmax.f32 %v796_v2, 0.0  ;;  %v710_v47 = vadd.f32 %v709_v22, %v2701_v1 }
 0x165   : > { %v999_v33 = vmax.f32 %v885_v6, 0.0  ;;  %1387 = vmatmul.bf16.gmra.mxu0 %v2786_v57  ;;  %v1000_v61 = vmax.f32 %v621_v45, 0.0 }
 0x166   : > { %1476 = vmatmul.bf16.gmra.mxu1 %v2789_v59  ;;  %1565 = vmatmul.bf16.gmra.mxu2 %v2795_v13  ;;  %v2937_v36 = vpack.c.bf16 %v998_v35, %v994_v31  ;;  %v1001_v63 = vmax.f32 %v710_v47, 0.0 }
 0x167   : > { %1654 = vmatmul.bf16.gmra.mxu3 %v2806_v18  ;;  %v2940_v44 = vpack.c.bf16 %v999_v33, %v995_v32 }
 0x169   : > { %v798_v46 = vpop.f32.mrf.mxu2 }
 0x16a   : > { %v887_v48 = vpop.f32.mrf.mxu3  ;;  %v622_v55 = vpop.f32.mrf.mxu0  ;;  %v799_v18 = vadd.f32 %v798_v46, %v2715_v12 }
 0x16b   : > { %v623_v56 = vadd.f32 %v622_v55, %v2699_v0  ;;  %v711_v57 = vpop.f32.mrf.mxu1  ;;  %v888_v26 = vadd.f32 %v887_v48, %v2718_v15 }
 0x16c   : > { %v712_v59 = vadd.f32 %v711_v57, %v2701_v1  ;;  %v1002_v23 = vmax.f32 %v799_v18, 0.0 }
 0x16d   : > { %v1004_v13 = vmax.f32 %v623_v56, 0.0  ;;  %v1003_v25 = vmax.f32 %v888_v26, 0.0 }
 0x16e   : > { %v1005_v7 = vmax.f32 %v712_v59, 0.0 }
 0x16f   : > { %v2946_v8 = vpack.c.bf16 %v1004_v13, %v1000_v61 }
 0x170   : > { %v2949_v24 = vpack.c.bf16 %v1005_v7, %v1001_v63 }
 0x171   : > { %v800_v9 = vpop.f32.mrf.mxu2 }
 0x172   : > { %v801_v41 = vadd.f32 %v800_v9, %v2715_v12  ;;  %v889_v10 = vpop.f32.mrf.mxu3  ;;  %v625_v17 = vpop.f32.mrf.mxu0 }
 0x173   : > { %v890_v42 = vadd.f32 %v889_v10, %v2718_v15  ;;  %v714_v51 = vpop.f32.mrf.mxu1  ;;  %v626_v31 = vadd.f32 %v625_v17, %v2699_v0 }
 0x174   : > { %v1006_v2 = vmax.f32 %v801_v41, 0.0  ;;  %v715_v32 = vadd.f32 %v714_v51, %v2701_v1 }
 0x175   : > { %v1007_v29 = vmax.f32 %v890_v42, 0.0  ;;  %1392 = vmatmul.bf16.gmra.mxu0 %v2815_v38  ;;  %v1008_v47 = vmax.f32 %v626_v31, 0.0 }
 0x176   : > { %1481 = vmatmul.bf16.gmra.mxu1 %v2818_v40  ;;  %1570 = vmatmul.bf16.gmra.mxu2 %v2824_v58  ;;  %v2957_v6 = vpack.c.bf16 %v1006_v2, %v1002_v23  ;;  %v1009_v48 = vmax.f32 %v715_v32, 0.0 }
 0x177   : > { %1659 = vmatmul.bf16.gmra.mxu3 %v2826_v60  ;;  %v2960_v22 = vpack.c.bf16 %v1007_v29, %v1003_v25 }
 0x179   : > { %v803_v35 = vpop.f32.mrf.mxu2 }
 0x17a   : > { %v892_v33 = vpop.f32.mrf.mxu3  ;;  %v627_v45 = vpop.f32.mrf.mxu0  ;;  %v804_v60 = vadd.f32 %v803_v35, %v2715_v12 }
 0x17b   : > { %v628_v46 = vadd.f32 %v627_v45, %v2699_v0  ;;  %v716_v38 = vpop.f32.mrf.mxu1  ;;  %v893_v59 = vadd.f32 %v892_v33, %v2718_v15 }
 0x17c   : > { %v717_v40 = vadd.f32 %v716_v38, %v2701_v1  ;;  %v1010_v9 = vmax.f32 %v804_v60, 0.0 }
 0x17d   : > { %v1012_v58 = vmax.f32 %v628_v46, 0.0  ;;  %v1011_v10 = vmax.f32 %v893_v59, 0.0 }
 0x17e   : > { %v1013_v55 = vmax.f32 %v717_v40, 0.0 }
 0x17f   : > { %v2966_v56 = vpack.c.bf16 %v1012_v58, %v1008_v47 }
 0x180   : > { %v2969_v57 = vpack.c.bf16 %v1013_v55, %v1009_v48 }
 0x181   : > { %v805_v61 = vpop.f32.mrf.mxu2 }
 0x182   : > { %v806_v13 = vadd.f32 %v805_v61, %v2715_v12  ;;  %v894_v63 = vpop.f32.mrf.mxu3  ;;  %v630_v7 = vpop.f32.mrf.mxu0 }
 0x183   : > { %v895_v18 = vadd.f32 %v894_v63, %v2718_v15  ;;  %v719_v26 = vpop.f32.mrf.mxu1  ;;  %v631_v23 = vadd.f32 %v630_v7, %v2699_v0 }
 0x184   : > { %v1014_v41 = vmax.f32 %v806_v13, 0.0  ;;  %v720_v25 = vadd.f32 %v719_v26, %v2701_v1 }
 0x185   : > { %v1015_v17 = vmax.f32 %v895_v18, 0.0  ;;  %1397 = vmatmul.bf16.gmra.mxu0 %v2832_v16  ;;  %v1016_v32 = vmax.f32 %v631_v23, 0.0 }
 0x186   : > { %1486 = vmatmul.bf16.gmra.mxu1 %v2835_v19  ;;  %1575 = vmatmul.bf16.gmra.mxu2 %v2841_v39  ;;  %v2977_v42 = vpack.c.bf16 %v1014_v41, %v1010_v9  ;;  %v1017_v33 = vmax.f32 %v720_v25, 0.0 }
 0x187   : > { %1664 = vmatmul.bf16.gmra.mxu3 %v2843_v43  ;;  %v2980_v51 = vpack.c.bf16 %v1015_v17, %v1011_v10 }
 0x189   : > { %v808_v2 = vpop.f32.mrf.mxu2 }
 0x18a   : > { %v897_v29 = vpop.f32.mrf.mxu3  ;;  %v632_v31 = vpop.f32.mrf.mxu0  ;;  %v809_v43 = vadd.f32 %v808_v2, %v2715_v12 }
 0x18b   : > { %v633_v35 = vadd.f32 %v632_v31, %v2699_v0  ;;  %v721_v16 = vpop.f32.mrf.mxu1  ;;  %v898_v40 = vadd.f32 %v897_v29, %v2718_v15 }
 0x18c   : > { %v722_v19 = vadd.f32 %v721_v16, %v2701_v1  ;;  %v1018_v61 = vmax.f32 %v809_v43, 0.0 }
 0x18d   : > { %v1020_v39 = vmax.f32 %v633_v35, 0.0  ;;  %v1019_v63 = vmax.f32 %v898_v40, 0.0 }
 0x18e   : > { %v1021_v45 = vmax.f32 %v722_v19, 0.0 }
 0x18f   : > { %v2986_v46 = vpack.c.bf16 %v1020_v39, %v1016_v32 }
 0x190   : > { %v2989_v38 = vpack.c.bf16 %v1021_v45, %v1017_v33 }
 0x191   : > { %v810_v47 = vpop.f32.mrf.mxu2 }
 0x192   : > { %v811_v58 = vadd.f32 %v810_v47, %v2715_v12  ;;  %v899_v48 = vpop.f32.mrf.mxu3  ;;  %v635_v55 = vpop.f32.mrf.mxu0 }
 0x193   : > { %v900_v60 = vadd.f32 %v899_v48, %v2718_v15  ;;  %v724_v59 = vpop.f32.mrf.mxu1  ;;  %v636_v9 = vadd.f32 %v635_v55, %v2699_v0 }
 0x194   : > { %v1022_v13 = vmax.f32 %v811_v58, 0.0  ;;  %v725_v10 = vadd.f32 %v724_v59, %v2701_v1 }
 0x195   : > { %v1023_v7 = vmax.f32 %v900_v60, 0.0  ;;  %1402 = vmatmul.bf16.gmra.mxu0 %v2849_v62  ;;  %v1024_v25 = vmax.f32 %v636_v9, 0.0 }
 0x196   : > { %1491 = vmatmul.bf16.gmra.mxu1 %v2852_v3  ;;  %1580 = vmatmul.bf16.gmra.mxu2 %v2858_v27  ;;  %v2997_v18 = vpack.c.bf16 %v1022_v13, %v1018_v61  ;;  %v1025_v29 = vmax.f32 %v725_v10, 0.0 }
 0x197   : > { %1669 = vmatmul.bf16.gmra.mxu3 %v2860_v28  ;;  %v3000_v26 = vpack.c.bf16 %v1023_v7, %v1019_v63 }
 0x199   : > { %v813_v41 = vpop.f32.mrf.mxu2 }
 0x19a   : > { %v902_v17 = vpop.f32.mrf.mxu3  ;;  %v637_v23 = vpop.f32.mrf.mxu0  ;;  %v814_v28 = vadd.f32 %v813_v41, %v2715_v12 }
 0x19b   : > { %v638_v2 = vadd.f32 %v637_v23, %v2699_v0  ;;  %v726_v62 = vpop.f32.mrf.mxu1  ;;  %v903_v19 = vadd.f32 %v902_v17, %v2718_v15 }
 0x19c   : > { %v727_v3 = vadd.f32 %v726_v62, %v2701_v1  ;;  %v1026_v47 = vmax.f32 %v814_v28, 0.0  ;;  %v3032_v62 = vld [vmem:[%s3182_s4] ss:$0 sm:$0xff] }
 0x19d   : > { %v1028_v27 = vmax.f32 %v638_v2, 0.0  ;;  %v1027_v48 = vmax.f32 %v903_v19, 0.0 }
 0x19e   : > { %v1029_v31 = vmax.f32 %v727_v3, 0.0 }
 0x19f   : > { %v3006_v35 = vpack.c.bf16 %v1028_v27, %v1024_v25 }
 0x1a0   : > { %v3009_v16 = vpack.c.bf16 %v1029_v31, %v1025_v29 }
 0x1a1   : > { %v815_v32 = vpop.f32.mrf.mxu2 }
 0x1a2   : > { %v816_v39 = vadd.f32 %v815_v32, %v2715_v12  ;;  %v904_v33 = vpop.f32.mrf.mxu3  ;;  %v640_v45 = vpop.f32.mrf.mxu0 }
 0x1a3   : > { %v905_v43 = vadd.f32 %v904_v33, %v2718_v15  ;;  %v729_v40 = vpop.f32.mrf.mxu1  ;;  %v641_v61 = vadd.f32 %v640_v45, %v2699_v0 }
 0x1a4   : > { %v1030_v58 = vmax.f32 %v816_v39, 0.0  ;;  %v730_v63 = vadd.f32 %v729_v40, %v2701_v1 }
 0x1a5   : > { %v1031_v55 = vmax.f32 %v905_v43, 0.0  ;;  %1407 = vmatmul.bf16.gmra.mxu0 %v2866_v50  ;;  %v1032_v10 = vmax.f32 %v641_v61, 0.0 }
 0x1a6   : > { %1496 = vmatmul.bf16.gmra.mxu1 %v2869_v53  ;;  %1585 = vmatmul.bf16.gmra.mxu2 %v2877_v11  ;;  %v3017_v60 = vpack.c.bf16 %v1030_v58, %v1026_v47  ;;  %v1033_v17 = vmax.f32 %v730_v63, 0.0 }
 0x1a7   : > { %1674 = vmatmul.bf16.gmra.mxu3 %v2880_v14  ;;  %v3020_v59 = vpack.c.bf16 %v1031_v55, %v1027_v48 }
 0x1a9   : > { %v818_v13 = vpop.f32.mrf.mxu2 }
 0x1aa   : > { %v907_v7 = vpop.f32.mrf.mxu3  ;;  %v642_v9 = vpop.f32.mrf.mxu0  ;;  %v819_v14 = vadd.f32 %v818_v13, %v2715_v12 }
 0x1ab   : > { %v643_v41 = vadd.f32 %v642_v9, %v2699_v0  ;;  %v731_v50 = vpop.f32.mrf.mxu1  ;;  %v908_v0 = vadd.f32 %v907_v7, %v2718_v15 }
 0x1ac   : > { %v732_v53 = vadd.f32 %v731_v50, %v2701_v1  ;;  %v1034_v19 = vmax.f32 %v819_v14, 0.0 }
 0x1ad   : > { %v1036_v11 = vmax.f32 %v643_v41, 0.0  ;;  %v1035_v33 = vmax.f32 %v908_v0, 0.0 }
 0x1ae   : > { %v1037_v23 = vmax.f32 %v732_v53, 0.0 }
 0x1af   : > { %v3026_v2 = vpack.c.bf16 %v1036_v11, %v1032_v10 }
 0x1b0   : > { %v3034_v3 = vpack.c.bf16 %v1037_v23, %v1033_v17 }
 0x1b1   : > { %v820_v25 = vpop.f32.mrf.mxu2 }
 0x1b2   : > { %v821_v1 = vadd.f32 %v820_v25, %v2715_v12  ;;  %v909_v27 = vpop.f32.mrf.mxu3  ;;  %v1373_v29 = vpop.f32.mrf.mxu0 }
 0x1b3   : > { %v910_v31 = vadd.f32 %v909_v27, %v2718_v15  ;;  %v1462_v28 = vpop.f32.mrf.mxu1  ;;  %v1374_v39 = vadd.f32 %v3032_v62, %v1373_v29 }
 0x1b4   : > { %v1038_v32 = vmax.f32 %v821_v1, 0.0 }
 0x1b5   : > { %v1039_v45 = vmax.f32 %v910_v31, 0.0  ;;  %1412 = vmatmul.bf16.gmra.mxu0 %v2886_v34  ;;  %v1463_v15 = vadd.f32 %v1462_v28, %v1374_v39 }
 0x1b6   : > { %1501 = vmatmul.bf16.gmra.mxu1 %v2889_v37  ;;  %1590 = vmatmul.bf16.gmra.mxu2 %v2897_v4  ;;  %v3044_v12 = vpack.c.bf16 %v1038_v32, %v1034_v19 }
 0x1b7   : > { %1679 = vmatmul.bf16.gmra.mxu3 %v2900_v5  ;;  %v3047_v43 = vpack.c.bf16 %v1039_v45, %v1035_v33 }
 0x1b9   : > { %v1551_v40 = vpop.f32.mrf.mxu2 }
 0x1ba   : > { %v1552_v47 = vadd.f32 %v1551_v40, %v1463_v15  ;;  %v1640_v58 = vpop.f32.mrf.mxu3  ;;  %v1375_v48 = vpop.f32.mrf.mxu0 }
 0x1bb   : > { %v1464_v55 = vpop.f32.mrf.mxu1  ;;  %v1376_v61 = vadd.f32 %v3032_v62, %v1375_v48 }
 0x1bc   : > { %v1641_v34 = vadd.f32 %v1640_v58, %v1552_v47 }
 0x1bd   : > { %v1465_v37 = vadd.f32 %v1464_v55, %v1376_v61 }
 0x1be   : > { %1720 = vst [vmem:[%s3052_s26] sm:$0xff] %v1641_v34 }
 0x1c1   : > { %v1553_v4 = vpop.f32.mrf.mxu2 }
 0x1c2   : > { %v1554_v5 = vadd.f32 %v1553_v4, %v1465_v37  ;;  %v1642_v13 = vpop.f32.mrf.mxu3  ;;  %v1378_v63 = vpop.f32.mrf.mxu0 }
 0x1c3   : > { %v1467_v7 = vpop.f32.mrf.mxu1  ;;  %v1379_v41 = vadd.f32 %v3032_v62, %v1378_v63 }
 0x1c4   : > { %v1643_v9 = vadd.f32 %v1642_v13, %v1554_v5 }
 0x1c5   : > { %1417 = vmatmul.bf16.gmra.mxu0 %v2906_v30  ;;  %v1468_v50 = vadd.f32 %v1467_v7, %v1379_v41 }
 0x1c6   : > { %1721 = vst [vmem:[%s3052_s26 + $0x8] sm:$0xff] %v1643_v9  ;;  %1506 = vmatmul.bf16.gmra.mxu1 %v2909_v20  ;;  %1595 = vmatmul.bf16.gmra.mxu2 %v2917_v52 }
 0x1c7   : > { %1684 = vmatmul.bf16.gmra.mxu3 %v2920_v54 }
 0x1c9   : > { %v1556_v53 = vpop.f32.mrf.mxu2 }
 0x1ca   : > { %v1557_v10 = vadd.f32 %v1556_v53, %v1468_v50  ;;  %v1645_v11 = vpop.f32.mrf.mxu3  ;;  %v1380_v17 = vpop.f32.mrf.mxu0 }
 0x1cb   : > { %v1469_v23 = vpop.f32.mrf.mxu1  ;;  %v1381_v0 = vadd.f32 %v3032_v62, %v1380_v17 }
 0x1cc   : > { %v1646_v14 = vadd.f32 %v1645_v11, %v1557_v10 }
 0x1cd   : > { %v1470_v25 = vadd.f32 %v1469_v23, %v1381_v0 }
 0x1ce   : > { %1722 = vst [vmem:[%s3052_s26 + $0x10] sm:$0xff] %v1646_v14 }
 0x1d1   : > { %v1558_v30 = vpop.f32.mrf.mxu2 }
 0x1d2   : > { %v1559_v1 = vadd.f32 %v1558_v30, %v1470_v25  ;;  %v1647_v27 = vpop.f32.mrf.mxu3  ;;  %v1383_v20 = vpop.f32.mrf.mxu0 }
 0x1d3   : > { %v1472_v29 = vpop.f32.mrf.mxu1  ;;  %v1384_v54 = vadd.f32 %v3032_v62, %v1383_v20 }
 0x1d4   : > { %v1648_v52 = vadd.f32 %v1647_v27, %v1559_v1 }
 0x1d5   : > { %1422 = vmatmul.bf16.gmra.mxu0 %v2926_v21  ;;  %v1473_v31 = vadd.f32 %v1472_v29, %v1384_v54 }
 0x1d6   : > { %1723 = vst [vmem:[%s3052_s26 + $0x18] sm:$0xff] %v1648_v52  ;;  %1511 = vmatmul.bf16.gmra.mxu1 %v2929_v49  ;;  %1600 = vmatmul.bf16.gmra.mxu2 %v2937_v36 }
 0x1d7   : > { %1689 = vmatmul.bf16.gmra.mxu3 %v2940_v44 }
 0x1d9   : > { %v1561_v28 = vpop.f32.mrf.mxu2 }
 0x1da   : > { %v1562_v19 = vadd.f32 %v1561_v28, %v1473_v31  ;;  %v1650_v32 = vpop.f32.mrf.mxu3  ;;  %v1385_v39 = vpop.f32.mrf.mxu0 }
 0x1db   : > { %v1474_v33 = vpop.f32.mrf.mxu1  ;;  %v1386_v15 = vadd.f32 %v3032_v62, %v1385_v39 }
 0x1dc   : > { %v1651_v45 = vadd.f32 %v1650_v32, %v1562_v19 }
 0x1dd   : > { %v1475_v40 = vadd.f32 %v1474_v33, %v1386_v15 }
 0x1de   : > { %1724 = vst [vmem:[%s3052_s26 + $0x20] sm:$0xff] %v1651_v45 }
 0x1e1   : > { %v1563_v21 = vpop.f32.mrf.mxu2 }
 0x1e2   : > { %v1564_v47 = vadd.f32 %v1563_v21, %v1475_v40  ;;  %v1652_v58 = vpop.f32.mrf.mxu3  ;;  %v1388_v49 = vpop.f32.mrf.mxu0 }
 0x1e3   : > { %v1477_v48 = vpop.f32.mrf.mxu1  ;;  %v1389_v44 = vadd.f32 %v3032_v62, %v1388_v49 }
 0x1e4   : > { %v1653_v36 = vadd.f32 %v1652_v58, %v1564_v47 }
 0x1e5   : > { %1427 = vmatmul.bf16.gmra.mxu0 %v2946_v8  ;;  %v1478_v55 = vadd.f32 %v1477_v48, %v1389_v44 }
 0x1e6   : > { %1725 = vst [vmem:[%s3052_s26 + $0x28] sm:$0xff] %v1653_v36  ;;  %1516 = vmatmul.bf16.gmra.mxu1 %v2949_v24  ;;  %1605 = vmatmul.bf16.gmra.mxu2 %v2957_v6 }
 0x1e7   : > { %1694 = vmatmul.bf16.gmra.mxu3 %v2960_v22 }
 0x1e9   : > { %v1566_v34 = vpop.f32.mrf.mxu2 }
 0x1ea   : > { %v1567_v61 = vadd.f32 %v1566_v34, %v1478_v55  ;;  %v1655_v37 = vpop.f32.mrf.mxu3  ;;  %v1390_v4 = vpop.f32.mrf.mxu0 }
 0x1eb   : > { %v1479_v5 = vpop.f32.mrf.mxu1  ;;  %v1391_v63 = vadd.f32 %v3032_v62, %v1390_v4 }
 0x1ec   : > { %v1656_v13 = vadd.f32 %v1655_v37, %v1567_v61 }
 0x1ed   : > { %v1480_v7 = vadd.f32 %v1479_v5, %v1391_v63 }
 0x1ee   : > { %1726 = vst [vmem:[%s3052_s26 + $0x30] sm:$0xff] %v1656_v13 }
 0x1f1   : > { %v1568_v8 = vpop.f32.mrf.mxu2 }
 0x1f2   : > { %v1569_v9 = vadd.f32 %v1568_v8, %v1480_v7  ;;  %v1657_v41 = vpop.f32.mrf.mxu3  ;;  %v1393_v24 = vpop.f32.mrf.mxu0 }
 0x1f3   : > { %v1482_v50 = vpop.f32.mrf.mxu1  ;;  %v1394_v22 = vadd.f32 %v3032_v62, %v1393_v24 }
 0x1f4   : > { %v1658_v6 = vadd.f32 %v1657_v41, %v1569_v9 }
 0x1f5   : > { %1432 = vmatmul.bf16.gmra.mxu0 %v2966_v56  ;;  %v1483_v53 = vadd.f32 %v1482_v50, %v1394_v22 }
 0x1f6   : > { %1727 = vst [vmem:[%s3052_s26 + $0x38] sm:$0xff] %v1658_v6  ;;  %1521 = vmatmul.bf16.gmra.mxu1 %v2969_v57  ;;  %1610 = vmatmul.bf16.gmra.mxu2 %v2977_v42 }
 0x1f7   : > { %1699 = vmatmul.bf16.gmra.mxu3 %v2980_v51 }
 0x1f9   : > { %v1571_v10 = vpop.f32.mrf.mxu2 }
 0x1fa   : > { %v1572_v11 = vadd.f32 %v1571_v10, %v1483_v53  ;;  %v1660_v17 = vpop.f32.mrf.mxu3  ;;  %v1395_v23 = vpop.f32.mrf.mxu0 }
 0x1fb   : > { %v1484_v14 = vpop.f32.mrf.mxu1  ;;  %v1396_v25 = vadd.f32 %v3032_v62, %v1395_v23 }
 0x1fc   : > { %v1661_v0 = vadd.f32 %v1660_v17, %v1572_v11 }
 0x1fd   : > { %v1485_v30 = vadd.f32 %v1484_v14, %v1396_v25 }
 0x1fe   : > { %1728 = vst [vmem:[%s3052_s26 + $0x40] sm:$0xff] %v1661_v0 }
 0x201   : > { %v1573_v56 = vpop.f32.mrf.mxu2 }
 0x202   : > { %v1574_v1 = vadd.f32 %v1573_v56, %v1485_v30  ;;  %v1662_v27 = vpop.f32.mrf.mxu3  ;;  %v1398_v57 = vpop.f32.mrf.mxu0 }
 0x203   : > { %v1487_v20 = vpop.f32.mrf.mxu1  ;;  %v1399_v51 = vadd.f32 %v3032_v62, %v1398_v57 }
 0x204   : > { %v1663_v42 = vadd.f32 %v1662_v27, %v1574_v1 }
 0x205   : > { %1437 = vmatmul.bf16.gmra.mxu0 %v2986_v46  ;;  %v1488_v29 = vadd.f32 %v1487_v20, %v1399_v51 }
 0x206   : > { %1729 = vst [vmem:[%s3052_s26 + $0x48] sm:$0xff] %v1663_v42  ;;  %1526 = vmatmul.bf16.gmra.mxu1 %v2989_v38  ;;  %1615 = vmatmul.bf16.gmra.mxu2 %v2997_v18 }
 0x207   : > { %1704 = vmatmul.bf16.gmra.mxu3 %v3000_v26 }
 0x209   : > { %v1576_v52 = vpop.f32.mrf.mxu2 }
 0x20a   : > { %v1577_v54 = vadd.f32 %v1576_v52, %v1488_v29  ;;  %v1665_v31 = vpop.f32.mrf.mxu3  ;;  %v1400_v28 = vpop.f32.mrf.mxu0 }
 0x20b   : > { %v1489_v19 = vpop.f32.mrf.mxu1  ;;  %v1401_v39 = vadd.f32 %v3032_v62, %v1400_v28 }
 0x20c   : > { %v1666_v32 = vadd.f32 %v1665_v31, %v1577_v54 }
 0x20d   : > { %v1490_v33 = vadd.f32 %v1489_v19, %v1401_v39 }
 0x20e   : > { %1730 = vst [vmem:[%s3052_s26 + $0x50] sm:$0xff] %v1666_v32 }
 0x211   : > { %v1578_v46 = vpop.f32.mrf.mxu2 }
 0x212   : > { %v1579_v45 = vadd.f32 %v1578_v46, %v1490_v33  ;;  %v1667_v15 = vpop.f32.mrf.mxu3  ;;  %v1403_v38 = vpop.f32.mrf.mxu0 }
 0x213   : > { %v1492_v40 = vpop.f32.mrf.mxu1  ;;  %v1404_v26 = vadd.f32 %v3032_v62, %v1403_v38 }
 0x214   : > { %v1668_v18 = vadd.f32 %v1667_v15, %v1579_v45 }
 0x215   : > { %1442 = vmatmul.bf16.gmra.mxu0 %v3006_v35  ;;  %v1493_v21 = vadd.f32 %v1492_v40, %v1404_v26 }
 0x216   : > { %1731 = vst [vmem:[%s3052_s26 + $0x58] sm:$0xff] %v1668_v18  ;;  %1531 = vmatmul.bf16.gmra.mxu1 %v3009_v16  ;;  %1620 = vmatmul.bf16.gmra.mxu2 %v3017_v60 }
 0x217   : > { %1709 = vmatmul.bf16.gmra.mxu3 %v3020_v59 }
 0x219   : > { %v1581_v47 = vpop.f32.mrf.mxu2 }
 0x21a   : > { %v1582_v58 = vadd.f32 %v1581_v47, %v1493_v21  ;;  %v1670_v49 = vpop.f32.mrf.mxu3  ;;  %v1405_v48 = vpop.f32.mrf.mxu0 }
 0x21b   : > { %v1494_v36 = vpop.f32.mrf.mxu1  ;;  %v1406_v55 = vadd.f32 %v3032_v62, %v1405_v48 }
 0x21c   : > { %v1671_v44 = vadd.f32 %v1670_v49, %v1582_v58 }
 0x21d   : > { %v1495_v34 = vadd.f32 %v1494_v36, %v1406_v55 }
 0x21e   : > { %1732 = vst [vmem:[%s3052_s26 + $0x60] sm:$0xff] %v1671_v44 }
 0x221   : > { %v1583_v35 = vpop.f32.mrf.mxu2 }
 0x222   : > { %v1584_v61 = vadd.f32 %v1583_v35, %v1495_v34  ;;  %v1672_v37 = vpop.f32.mrf.mxu3  ;;  %v1408_v16 = vpop.f32.mrf.mxu0 }
 0x223   : > { %v1497_v4 = vpop.f32.mrf.mxu1  ;;  %v1409_v59 = vadd.f32 %v3032_v62, %v1408_v16 }
 0x224   : > { %v1673_v60 = vadd.f32 %v1672_v37, %v1584_v61 }
 0x225   : > { %1447 = vmatmul.bf16.gmra.mxu0 %v3026_v2  ;;  %v1498_v5 = vadd.f32 %v1497_v4, %v1409_v59 }
 0x226   : > { %1733 = vst [vmem:[%s3052_s26 + $0x68] sm:$0xff] %v1673_v60  ;;  %1536 = vmatmul.bf16.gmra.mxu1 %v3034_v3  ;;  %1625 = vmatmul.bf16.gmra.mxu2 %v3044_v12 }
 0x227   : > { %1714 = vmatmul.bf16.gmra.mxu3 %v3047_v43 }
 0x229   : > { %v1586_v13 = vpop.f32.mrf.mxu2 }
 0x22a   : > { %v1587_v63 = vadd.f32 %v1586_v13, %v1498_v5  ;;  %v1675_v7 = vpop.f32.mrf.mxu3  ;;  %v1410_v8 = vpop.f32.mrf.mxu0 }
 0x22b   : > { %v1499_v9 = vpop.f32.mrf.mxu1  ;;  %v1411_v24 = vadd.f32 %v3032_v62, %v1410_v8 }
 0x22c   : > { %v1676_v41 = vadd.f32 %v1675_v7, %v1587_v63 }
 0x22d   : > { %v1500_v50 = vadd.f32 %v1499_v9, %v1411_v24 }
 0x22e   : > { %1734 = vst [vmem:[%s3052_s26 + $0x70] sm:$0xff] %v1676_v41 }
 0x231   : > { %v1588_v2 = vpop.f32.mrf.mxu2 }
 0x232   : > { %v1589_v6 = vadd.f32 %v1588_v2, %v1500_v50  ;;  %v1677_v3 = vpop.f32.mrf.mxu3  ;;  %v1413_v22 = vpop.f32.mrf.mxu0 }
 0x233   : > { %v1502_v12 = vpop.f32.mrf.mxu1  ;;  %v1414_v43 = vadd.f32 %v3032_v62, %v1413_v22 }
 0x234   : > { %v1678_v53 = vadd.f32 %v1677_v3, %v1589_v6 }
 0x235   : > { %v1503_v10 = vadd.f32 %v1502_v12, %v1414_v43 }
 0x236   : > { %1735 = vst [vmem:[%s3052_s26 + $0x78] sm:$0xff] %v1678_v53 }
 0x239   : > { %v1591_v11 = vpop.f32.mrf.mxu2 }
 0x23a   : > { %v1592_v17 = vadd.f32 %v1591_v11, %v1503_v10  ;;  %v1680_v23 = vpop.f32.mrf.mxu3  ;;  %v1415_v14 = vpop.f32.mrf.mxu0 }
 0x23b   : > { %v1504_v0 = vpop.f32.mrf.mxu1  ;;  %v1416_v30 = vadd.f32 %v3032_v62, %v1415_v14 }
 0x23c   : > { %v1681_v25 = vadd.f32 %v1680_v23, %v1592_v17 }
 0x23d   : > { %v1505_v56 = vadd.f32 %v1504_v0, %v1416_v30 }
 0x23e   : > { %1736 = vst [vmem:[%s3052_s26 + $0x80] sm:$0xff] %v1681_v25 }
 0x241   : > { %v1593_v1 = vpop.f32.mrf.mxu2 }
 0x242   : > { %v1594_v27 = vadd.f32 %v1593_v1, %v1505_v56  ;;  %v1682_v57 = vpop.f32.mrf.mxu3  ;;  %v1418_v20 = vpop.f32.mrf.mxu0 }
 0x243   : > { %v1507_v42 = vpop.f32.mrf.mxu1  ;;  %v1419_v29 = vadd.f32 %v3032_v62, %v1418_v20 }
 0x244   : > { %v1683_v51 = vadd.f32 %v1682_v57, %v1594_v27 }
 0x245   : > { %v1508_v52 = vadd.f32 %v1507_v42, %v1419_v29 }
 0x246   : > { %1737 = vst [vmem:[%s3052_s26 + $0x88] sm:$0xff] %v1683_v51 }
 0x249   : > { %v1596_v54 = vpop.f32.mrf.mxu2 }
 0x24a   : > { %v1597_v31 = vadd.f32 %v1596_v54, %v1508_v52  ;;  %v1685_v28 = vpop.f32.mrf.mxu3  ;;  %v1420_v19 = vpop.f32.mrf.mxu0 }
 0x24b   : > { %v1509_v32 = vpop.f32.mrf.mxu1  ;;  %v1421_v33 = vadd.f32 %v3032_v62, %v1420_v19 }
 0x24c   : > { %v1686_v39 = vadd.f32 %v1685_v28, %v1597_v31 }
 0x24d   : > { %v1510_v46 = vadd.f32 %v1509_v32, %v1421_v33 }
 0x24e   : > { %1738 = vst [vmem:[%s3052_s26 + $0x90] sm:$0xff] %v1686_v39 }
 0x251   : > { %v1598_v45 = vpop.f32.mrf.mxu2 }
 0x252   : > { %v1599_v15 = vadd.f32 %v1598_v45, %v1510_v46  ;;  %v1687_v38 = vpop.f32.mrf.mxu3  ;;  %v1423_v40 = vpop.f32.mrf.mxu0 }
 0x253   : > { %v1512_v18 = vpop.f32.mrf.mxu1  ;;  %v1424_v21 = vadd.f32 %v3032_v62, %v1423_v40 }
 0x254   : > { %v1688_v26 = vadd.f32 %v1687_v38, %v1599_v15 }
 0x255   : > { %v1513_v47 = vadd.f32 %v1512_v18, %v1424_v21 }
 0x256   : > { %1739 = vst [vmem:[%s3052_s26 + $0x98] sm:$0xff] %v1688_v26 }
 0x259   : > { %v1601_v58 = vpop.f32.mrf.mxu2 }
 0x25a   : > { %v1602_v49 = vadd.f32 %v1601_v58, %v1513_v47  ;;  %v1690_v48 = vpop.f32.mrf.mxu3  ;;  %v1425_v36 = vpop.f32.mrf.mxu0 }
 0x25b   : > { %v1514_v44 = vpop.f32.mrf.mxu1  ;;  %v1426_v34 = vadd.f32 %v3032_v62, %v1425_v36 }
 0x25c   : > { %v1691_v55 = vadd.f32 %v1690_v48, %v1602_v49 }
 0x25d   : > { %v1515_v35 = vadd.f32 %v1514_v44, %v1426_v34 }
 0x25e   : > { %1740 = vst [vmem:[%s3052_s26 + $0xa0] sm:$0xff] %v1691_v55 }
 0x261   : > { %v1603_v61 = vpop.f32.mrf.mxu2 }
 0x262   : > { %v1604_v37 = vadd.f32 %v1603_v61, %v1515_v35  ;;  %v1692_v16 = vpop.f32.mrf.mxu3  ;;  %v1428_v4 = vpop.f32.mrf.mxu0 }
 0x263   : > { %v1517_v60 = vpop.f32.mrf.mxu1  ;;  %v1429_v5 = vadd.f32 %v3032_v62, %v1428_v4 }
 0x264   : > { %v1693_v59 = vadd.f32 %v1692_v16, %v1604_v37 }
 0x265   : > { %v1518_v13 = vadd.f32 %v1517_v60, %v1429_v5 }
 0x266   : > { %1741 = vst [vmem:[%s3052_s26 + $0xa8] sm:$0xff] %v1693_v59 }
 0x269   : > { %v1606_v63 = vpop.f32.mrf.mxu2 }
 0x26a   : > { %v1607_v7 = vadd.f32 %v1606_v63, %v1518_v13  ;;  %v1695_v8 = vpop.f32.mrf.mxu3  ;;  %v1430_v9 = vpop.f32.mrf.mxu0 }
 0x26b   : > { %v1519_v41 = vpop.f32.mrf.mxu1  ;;  %v1431_v50 = vadd.f32 %v3032_v62, %v1430_v9 }
 0x26c   : > { %v1696_v24 = vadd.f32 %v1695_v8, %v1607_v7 }
 0x26d   : > { %v1520_v2 = vadd.f32 %v1519_v41, %v1431_v50 }
 0x26e   : > { %1742 = vst [vmem:[%s3052_s26 + $0xb0] sm:$0xff] %v1696_v24 }
 0x271   : > { %v1608_v6 = vpop.f32.mrf.mxu2 }
 0x272   : > { %v1609_v3 = vadd.f32 %v1608_v6, %v1520_v2  ;;  %v1697_v22 = vpop.f32.mrf.mxu3  ;;  %v1433_v12 = vpop.f32.mrf.mxu0 }
 0x273   : > { %v1522_v53 = vpop.f32.mrf.mxu1  ;;  %v1434_v10 = vadd.f32 %v3032_v62, %v1433_v12 }
 0x274   : > { %v1698_v43 = vadd.f32 %v1697_v22, %v1609_v3 }
 0x275   : > { %v1523_v11 = vadd.f32 %v1522_v53, %v1434_v10 }
 0x276   : > { %1743 = vst [vmem:[%s3052_s26 + $0xb8] sm:$0xff] %v1698_v43 }
 0x279   : > { %v1611_v17 = vpop.f32.mrf.mxu2 }
 0x27a   : > { %v1612_v23 = vadd.f32 %v1611_v17, %v1523_v11  ;;  %v1700_v14 = vpop.f32.mrf.mxu3  ;;  %v1435_v0 = vpop.f32.mrf.mxu0 }
 0x27b   : > { %v1524_v25 = vpop.f32.mrf.mxu1  ;;  %v1436_v56 = vadd.f32 %v3032_v62, %v1435_v0 }
 0x27c   : > { %v1701_v30 = vadd.f32 %v1700_v14, %v1612_v23 }
 0x27d   : > { %v1525_v1 = vadd.f32 %v1524_v25, %v1436_v56 }
 0x27e   : > { %1744 = vst [vmem:[%s3052_s26 + $0xc0] sm:$0xff] %v1701_v30 }
 0x281   : > { %v1613_v27 = vpop.f32.mrf.mxu2 }
 0x282   : > { %v1614_v57 = vadd.f32 %v1613_v27, %v1525_v1  ;;  %v1702_v20 = vpop.f32.mrf.mxu3  ;;  %v1438_v42 = vpop.f32.mrf.mxu0 }
 0x283   : > { %v1527_v51 = vpop.f32.mrf.mxu1  ;;  %v1439_v52 = vadd.f32 %v3032_v62, %v1438_v42 }
 0x284   : > { %v1703_v29 = vadd.f32 %v1702_v20, %v1614_v57 }
 0x285   : > { %v1528_v54 = vadd.f32 %v1527_v51, %v1439_v52 }
 0x286   : > { %1745 = vst [vmem:[%s3052_s26 + $0xc8] sm:$0xff] %v1703_v29 }
 0x289   : > { %v1616_v31 = vpop.f32.mrf.mxu2 }
 0x28a   : > { %v1617_v28 = vadd.f32 %v1616_v31, %v1528_v54  ;;  %v1705_v19 = vpop.f32.mrf.mxu3  ;;  %v1440_v32 = vpop.f32.mrf.mxu0 }
 0x28b   : > { %v1529_v39 = vpop.f32.mrf.mxu1  ;;  %v1441_v46 = vadd.f32 %v3032_v62, %v1440_v32 }
 0x28c   : > { %v1706_v33 = vadd.f32 %v1705_v19, %v1617_v28 }
 0x28d   : > { %v1530_v45 = vadd.f32 %v1529_v39, %v1441_v46 }
 0x28e   : > { %1746 = vst [vmem:[%s3052_s26 + $0xd0] sm:$0xff] %v1706_v33 }
 0x291   : > { %v1618_v15 = vpop.f32.mrf.mxu2 }
 0x292   : > { %v1619_v38 = vadd.f32 %v1618_v15, %v1530_v45  ;;  %v1707_v40 = vpop.f32.mrf.mxu3  ;;  %v1443_v18 = vpop.f32.mrf.mxu0 }
 0x293   : > { %v1532_v26 = vpop.f32.mrf.mxu1  ;;  %v1444_v47 = vadd.f32 %v3032_v62, %v1443_v18 }
 0x294   : > { %v1708_v21 = vadd.f32 %v1707_v40, %v1619_v38 }
 0x295   : > { %v1533_v58 = vadd.f32 %v1532_v26, %v1444_v47 }
 0x296   : > { %1747 = vst [vmem:[%s3052_s26 + $0xd8] sm:$0xff] %v1708_v21 }
 0x299   : > { %v1621_v49 = vpop.f32.mrf.mxu2 }
 0x29a   : > { %v1622_v48 = vadd.f32 %v1621_v49, %v1533_v58  ;;  %v1710_v36 = vpop.f32.mrf.mxu3  ;;  %v1445_v44 = vpop.f32.mrf.mxu0 }
 0x29b   : > { %v1534_v55 = vpop.f32.mrf.mxu1  ;;  %v1446_v35 = vadd.f32 %v3032_v62, %v1445_v44 }
 0x29c   : > { %v1711_v34 = vadd.f32 %v1710_v36, %v1622_v48 }
 0x29d   : > { %v1535_v61 = vadd.f32 %v1534_v55, %v1446_v35 }
 0x29e   : > { %1748 = vst [vmem:[%s3052_s26 + $0xe0] sm:$0xff] %v1711_v34 }
 0x2a1   : > { %v1623_v37 = vpop.f32.mrf.mxu2 }
 0x2a2   : > { %v1624_v16 = vadd.f32 %v1623_v37, %v1535_v61  ;;  %v1712_v4 = vpop.f32.mrf.mxu3  ;;  %v1448_v60 = vpop.f32.mrf.mxu0 }
 0x2a3   : > { %v1449_v5 = vadd.f32 %v3032_v62, %v1448_v60  ;;  %v1537_v13 = vpop.f32.mrf.mxu1 }
 0x2a4   : > { %v1713_v59 = vadd.f32 %v1712_v4, %v1624_v16 }
 0x2a5   : > { %v1538_v63 = vadd.f32 %v1537_v13, %v1449_v5 }
 0x2a6   : > { %1749 = vst [vmem:[%s3052_s26 + $0xe8] sm:$0xff] %v1713_v59 }
 0x2a9   : > { %v1626_v7 = vpop.f32.mrf.mxu2 }
 0x2aa   : > { %v1627_v8 = vadd.f32 %v1626_v7, %v1538_v63  ;;  %v1715_v9 = vpop.f32.mrf.mxu3  ;;  %v1450_v41 = vpop.f32.mrf.mxu0 }
 0x2ab   : > { %v1451_v50 = vadd.f32 %v3032_v62, %v1450_v41  ;;  %v1539_v2 = vpop.f32.mrf.mxu1 }
 0x2ac   : > { %v1716_v24 = vadd.f32 %v1715_v9, %v1627_v8 }
 0x2ad   : > { %v1540_v6 = vadd.f32 %v1539_v2, %v1451_v50 }
 0x2ae   : > { %1750 = vst [vmem:[%s3052_s26 + $0xf0] sm:$0xff] %v1716_v24 }
 0x2b1   : > { %v1628_v3 = vpop.f32.mrf.mxu2 }
 0x2b2   : > { %v1629_v22 = vadd.f32 %v1628_v3, %v1540_v6  ;;  %v1717_v12 = vpop.f32.mrf.mxu3 }
 0x2b4   : > { %v1718_v53 = vadd.f32 %v1717_v12, %v1629_v22 }
 0x2b6   : > { %1751 = vst [vmem:[%s3052_s26 + $0xf8] sm:$0xff] %v1718_v53 }
 0x2b7   : > { %2312 = shalt.err (!%p2309_p3)
}
 0x2b8   : > { %s2349_s17 = smov 128   ;;  %s2350_s23 = smov 8  }
 0x2b9   : > { %2243 = dma.vmem_to_hbm [thread:$0]  (%p2419_p5), %s1766_s9, 4096, %s1768_s11, %s1753_s22, %s2349_s17, %s2349_s17, %s2350_s23  }
 0x2ba PF: > { %p2249_p4 = scmp.ge.s32.totalorder %s2347_s21, 2  ;;  %s1782_s26 = sand.u32 1, %s2335_s18  }
 0x2bb   : > { %s1783_s30 = scalar_lea.sflag [#allocation3], %s1782_s26 }
 0x2bc   : > { %p2246_p7 = pnand %p2249_p4, %p2423_p6 }
 0x2be   : > { %p2247_p8 = pneg %p2246_p7 }
 0x2c0   : > { %2330 = dma.done.wait (%p2247_p8), %s1783_s30, 4096  }
 0x2c1   : > { %2332 = vsyncadd (%p2247_p8), %s1783_s30, 4294963200  ;;  %p15_p9 = scmp.ge.s32.totalorder %s2406_s24, 4   ;;  %s3186_s18 = smov %s2339_s19 }
 0x2c2   : > { %s3187_s19 = smov %s2343_s20  ;;  %s3188_s20 = smov %s2417_s27 }
 0x2c3   : > { %s3189_s21 = smov %s2406_s24  ;;  %17 = sbr.rel (!%p15_p9) target bundleno = 3 (0x3), region = 75 }
 0x2c8   :  { %1789 = vsyncpa [#allocation3], 1 }
 0x2c9   :  { %1791 = vsyncpa [#allocation3 + $0x1], 1 }

</bundles_post_ra>
